<compile_context>
chip_gen: v7x
topology: tpu7x:2x2x1
jax: 0.10.0
libtpu: 0.0.40
codegen_flags: <defaults>
</compile_context>

<pallas_src>
import jax
import jax.numpy as jnp
from jax import lax
from jax.experimental import pallas as pl
from jax.experimental.pallas import tpu as pltpu


def _round_up(x, m):
    return (x + m - 1) // m * m


# ---------------------------------------------------------------------------
# Kernel 1: per-edge messages   msg_e = x[src_e] * r[type_e] * norm_e
#           (double-buffered row-gather DMA pipeline over edge tiles)
# ---------------------------------------------------------------------------
def edge_message_kernel(src_ref,             # SMEM [E_pad] int32 (scalar prefetch)
                        type_ref, norm_ref,  # VMEM [TE,1] int32 / f32
                        r_ref,               # VMEM [R, D] bf16 (grid-resident)
                        x_hbm,               # ANY  [N_pad, D] f32
                        msg_ref,             # out  [TE, D] f32
                        xs0, xs1, sem):      # 2x VMEM [TE, D] f32, DMA sem [2]
    t = pl.program_id(0)
    nt = pl.num_programs(0)
    te, d = msg_ref.shape

    def issue(tile, buf, s):
        base = tile * te

        @pl.loop(0, te)
        def _(i):
            pltpu.make_async_copy(
                x_hbm.at[pl.ds(src_ref[base + i], 1), :],
                buf.at[pl.ds(i, 1), :],
                sem.at[s]).start()

    def drain(buf, s):
        @pl.loop(0, te)
        def _(i):
            pltpu.make_async_copy(
                x_hbm.at[pl.ds(0, 1), :],
                buf.at[pl.ds(i, 1), :],
                sem.at[s]).wait()

    # Prime the pipeline on the first grid step (grid axis is "arbitrary",
    # i.e. strictly sequential, so this double-buffer chain is well defined).
    @pl.when(t == 0)
    def _():
        issue(0, xs0, 0)

    # Prefetch next tile's rows into the *other* slot before touching this
    # tile's data: those DMAs fly while we drain/compute/write tile t.
    nxt = t + 1

    @pl.when(jnp.logical_and(nxt < nt, nxt % 2 == 0))
    def _():
        issue(nxt, xs0, 0)

    @pl.when(jnp.logical_and(nxt < nt, nxt % 2 == 1))
    def _():
        issue(nxt, xs1, 1)

    # Relation rows for this tile via a tiny one-hot matmul (R is small).
    nrel = r_ref.shape[0]
    onehot = (type_ref[...] ==
              lax.broadcasted_iota(jnp.int32, (te, nrel), 1)).astype(jnp.bfloat16)
    r_typ = jnp.dot(onehot, r_ref[...], preferred_element_type=jnp.float32)
    scale = r_typ * norm_ref[...]          # [TE, D] * [TE, 1] -> [TE, D]

    @pl.when(t % 2 == 0)
    def _():
        drain(xs0, 0)
        msg_ref[...] = xs0[...] * scale

    @pl.when(t % 2 == 1)
    def _():
        drain(xs1, 1)
        msg_ref[...] = xs1[...] * scale


def edge_messages(x, r, src, etype2d, norm2d, *, te=128):
    e_pad = src.shape[0]
    _, d = x.shape
    nrel = r.shape[0]
    return pl.pallas_call(
        edge_message_kernel,
        out_shape=jax.ShapeDtypeStruct((e_pad, d), jnp.float32),
        grid_spec=pltpu.PrefetchScalarGridSpec(
            num_scalar_prefetch=1,
            grid=(e_pad // te,),
            in_specs=[
                pl.BlockSpec((te, 1), lambda t, src: (t, 0)),    # edge type
                pl.BlockSpec((te, 1), lambda t, src: (t, 0)),    # edge norm
                pl.BlockSpec((nrel, d), lambda t, src: (0, 0)),  # r (VMEM-resident)
                pl.BlockSpec(memory_space=pl.ANY),               # x stays in HBM
            ],
            out_specs=pl.BlockSpec((te, d), lambda t, src: (t, 0)),
            scratch_shapes=[
                pltpu.VMEM((te, d), jnp.float32),
                pltpu.VMEM((te, d), jnp.float32),
                pltpu.SemaphoreType.DMA((2,)),
            ],
        ),
        compiler_params=pltpu.CompilerParams(
            # "arbitrary": the manual double-buffer chain needs sequential
            # iteration over the edge tiles.
            dimension_semantics=("arbitrary",),
        ),
    )(src, etype2d, norm2d, r, x)


# ---------------------------------------------------------------------------
# Kernel 2: node combine   x_out = tanh(agg @ W + b)   (tiled over node rows)
# ---------------------------------------------------------------------------
def combine_kernel(agg_ref, w_ref, b_ref, xo_ref):
    h = jnp.dot(agg_ref[...].astype(jnp.bfloat16), w_ref[...],
                preferred_element_type=jnp.float32) + b_ref[...]
    xo_ref[...] = jnp.tanh(h)


def combine(agg, w, b, *, tn=128):
    n_pad, din = agg.shape
    dout = w.shape[1]
    return pl.pallas_call(
        combine_kernel,
        out_shape=jax.ShapeDtypeStruct((n_pad, dout), jnp.float32),
        grid=(n_pad // tn,),
        in_specs=[
            pl.BlockSpec((tn, din), lambda i: (i, 0)),
            pl.BlockSpec((din, dout), lambda i: (0, 0)),
            pl.BlockSpec((1, dout), lambda i: (0, 0)),
        ],
        out_specs=pl.BlockSpec((tn, dout), lambda i: (i, 0)),
        compiler_params=pltpu.CompilerParams(
            dimension_semantics=("parallel",),
        ),
        cost_estimate=pl.CostEstimate(
            flops=2 * n_pad * din * dout,
            transcendentals=n_pad * dout,
            bytes_accessed=agg.size * 4 + w.size * 2 + b.size * 4 + n_pad * dout * 4,
        ),
    )(agg, w, b)


# ---------------------------------------------------------------------------
# Kernel 3: relation projection   r_out = r @ W_rel   (tiny, once per layer)
# ---------------------------------------------------------------------------
def rel_proj_kernel(r_ref, w_ref, ro_ref):
    ro_ref[...] = jnp.dot(r_ref[...], w_ref[...],
                          preferred_element_type=jnp.float32).astype(ro_ref.dtype)


def rel_proj(r, w_rel):
    nrel, din = r.shape
    dout = w_rel.shape[1]
    return pl.pallas_call(
        rel_proj_kernel,
        out_shape=jax.ShapeDtypeStruct((nrel, dout), jnp.bfloat16),
        grid=(1,),
        in_specs=[pl.BlockSpec((nrel, din), lambda i: (0, 0)),
                  pl.BlockSpec((din, dout), lambda i: (0, 0))],
        out_specs=pl.BlockSpec((nrel, dout), lambda i: (0, 0)),
        compiler_params=pltpu.CompilerParams(dimension_semantics=("arbitrary",)),
    )(r, w_rel)


# ---------------------------------------------------------------------------
# Kernel 4: fused gather + 'mult' combine + fc   score = (x[subj]*x[obj]) @ Wfc + b
# ---------------------------------------------------------------------------
def score_kernel(subj_ref, obj_ref,        # SMEM [B_pad] int32 (scalar prefetch)
                 x_hbm,                    # ANY  [N_pad, D] f32
                 wfc_ref, bfc_ref,         # VMEM [D, Rp] bf16, [1, Rp] f32
                 out_ref,                  # out  [TB, Rp] f32
                 sub_buf, obj_buf, sem):   # scratch VMEM [TB, D] f32 x2, DMA sem [2]
    tb = sub_buf.shape[0]
    base = pl.program_id(0) * tb

    @pl.loop(0, tb)
    def _start(i):
        pltpu.make_async_copy(x_hbm.at[pl.ds(subj_ref[base + i], 1), :],
                              sub_buf.at[pl.ds(i, 1), :], sem.at[0]).start()
        pltpu.make_async_copy(x_hbm.at[pl.ds(obj_ref[base + i], 1), :],
                              obj_buf.at[pl.ds(i, 1), :], sem.at[1]).start()

    @pl.loop(0, tb)
    def _wait(i):
        pltpu.make_async_copy(x_hbm.at[pl.ds(0, 1), :],
                              sub_buf.at[pl.ds(i, 1), :], sem.at[0]).wait()
        pltpu.make_async_copy(x_hbm.at[pl.ds(0, 1), :],
                              obj_buf.at[pl.ds(i, 1), :], sem.at[1]).wait()

    edge = (sub_buf[...] * obj_buf[...]).astype(jnp.bfloat16)   # 'mult' combine
    out_ref[...] = (jnp.dot(edge, wfc_ref[...],
                            preferred_element_type=jnp.float32) + bfc_ref[...])


def score_fn(x, subj, obj, wfc, bfc, *, tb=128):
    b_pad = subj.shape[0]
    _, d = x.shape
    rp = wfc.shape[1]
    return pl.pallas_call(
        score_kernel,
        out_shape=jax.ShapeDtypeStruct((b_pad, rp), jnp.float32),
        grid_spec=pltpu.PrefetchScalarGridSpec(
            num_scalar_prefetch=2,
            grid=(b_pad // tb,),
            in_specs=[
                pl.BlockSpec(memory_space=pl.ANY),               # x in HBM
                pl.BlockSpec((d, rp), lambda t, s, o: (0, 0)),
                pl.BlockSpec((1, rp), lambda t, s, o: (0, 0)),
            ],
            out_specs=pl.BlockSpec((tb, rp), lambda t, s, o: (t, 0)),
            scratch_shapes=[
                pltpu.VMEM((tb, d), jnp.float32),
                pltpu.VMEM((tb, d), jnp.float32),
                pltpu.SemaphoreType.DMA((2,)),
            ],
        ),
        compiler_params=pltpu.CompilerParams(
            dimension_semantics=("parallel",),
        ),
    )(subj, obj, x, wfc, bfc)


# ---------------------------------------------------------------------------
# Model: parameter construction + forward (glue in plain JAX)
# ---------------------------------------------------------------------------
def xavier_normal(key, shape, gain):
    fan_in, fan_out = shape
    std = gain * jnp.sqrt(2.0 / (fan_in + fan_out))
    return std * jax.random.normal(key, shape, dtype=jnp.float32)


def init_params(key, num_ent, num_rel, init_dim, gcn_dim, embed_dim, n_layer,
                *, n_pad, rel_pad):
    gain = jnp.sqrt(2.0)  # nn.init.calculate_gain('relu')
    keys = jax.random.split(key, 3 + 2 * n_layer)
    emb = xavier_normal(keys[0], (num_ent + 1, init_dim), gain)
    emb = jnp.pad(emb, ((0, n_pad - (num_ent + 1)), (0, 0)))
    fc_w = xavier_normal(keys[2], (embed_dim, num_rel), 1.0)
    fc_w = jnp.pad(fc_w, ((0, 0), (0, rel_pad - num_rel)))      # lane-dense fc out
    params = {
        "init_embed": emb,                                                   # f32
        "init_rel": xavier_normal(keys[1], (num_rel, init_dim),
                                  gain).astype(jnp.bfloat16),
        "fc_w": fc_w.astype(jnp.bfloat16),
        "fc_b": jnp.zeros((1, rel_pad), jnp.float32),
        "layers": [],
    }
    for i in range(n_layer):
        din = init_dim if i == 0 else gcn_dim
        dout = embed_dim if i == n_layer - 1 else gcn_dim
        kw, kwr = jax.random.split(keys[3 + 2 * i], 2)
        params["layers"].append({
            "w": xavier_normal(kw, (din, dout), gain).astype(jnp.bfloat16),
            "b": jnp.zeros((1, dout), jnp.float32),
            "w_rel": xavier_normal(kwr, (din, dout), gain).astype(jnp.bfloat16),
        })
    return params


def forward(params, graph, subj, obj):
    """graph = (src, dst, edge_type[:,None], edge_norm[:,None]); all padded."""
    src, dst, etype2d, norm2d = graph
    x = params["init_embed"]            # [N_pad, D] f32
    r = params["init_rel"]              # [R, D]    bf16
    n_layer = len(params["layers"])
    n_pad = x.shape[0]
    for li, layer in enumerate(params["layers"]):
        msg = edge_messages(x, r, src, etype2d, norm2d)            # [E_pad, Din] f32
        agg = jax.ops.segment_sum(msg, dst, num_segments=n_pad)    # scatter-add
        x = combine(agg, layer["w"], layer["b"])                   # [N_pad, Dout] f32
        if li != n_layer - 1:            # last layer's r output is unused by forward()
            r = rel_proj(r, layer["w_rel"])
        # hid_drop / input_drop = 0.0 -> identity
    return score_fn(x, subj, obj, params["fc_w"], params["fc_b"])  # [B_pad, rel_pad]


# ---------------------------------------------------------------------------
if __name__ == "__main__":
    # small but TPU-friendly shapes (feature dims are one 128-lane vreg wide)
    num_ent, num_rel = 255, 8            # N = num_ent + 1 = 256 nodes
    init_dim = gcn_dim = embed_dim = 128
    n_layer = 2
    num_edges = 500
    batch = 100

    TE, TB, TN, REL_PAD = 128, 128, 128, 128
    n_nodes = num_ent + 1
    n_pad = _round_up(n_nodes, TN)
    e_pad = _round_up(num_edges, TE)
    b_pad = _round_up(batch, TB)

    key = jax.random.PRNGKey(0)
    (k_param, k_src, k_dst, k_typ, k_norm, k_subj, k_obj) = jax.random.split(key, 7)

    params = init_params(k_param, num_ent, num_rel, init_dim, gcn_dim,
                         embed_dim, n_layer, n_pad=n_pad, rel_pad=REL_PAD)

    # random graph; padded edges get norm = 0 so they contribute exactly zero
    src = jax.random.randint(k_src, (num_edges,), 0, n_nodes, dtype=jnp.int32)
    dst = jax.random.randint(k_dst, (num_edges,), 0, n_nodes, dtype=jnp.int32)
    etype = jax.random.randint(k_typ, (num_edges,), 0, num_rel, dtype=jnp.int32)
    norm = jax.random.uniform(k_norm, (num_edges,), jnp.float32, 0.1, 1.0)

    pad_e = e_pad - num_edges
    src = jnp.pad(src, (0, pad_e))
    dst = jnp.pad(dst, (0, pad_e))
    etype2d = jnp.pad(etype, (0, pad_e))[:, None]
    norm2d = jnp.pad(norm, (0, pad_e))[:, None]
    graph = (src, dst, etype2d, norm2d)

    subj = jax.random.randint(k_subj, (batch,), 0, n_nodes, dtype=jnp.int32)
    obj = jax.random.randint(k_obj, (batch,), 0, n_nodes, dtype=jnp.int32)
    subj_pad = jnp.pad(subj, (0, b_pad - batch))
    obj_pad = jnp.pad(obj, (0, b_pad - batch))

    fwd = jax.jit(forward)
    score_padded = fwd(params, graph, subj_pad, obj_pad)   # [B_pad, REL_PAD]
    score = score_padded[:batch, :num_rel]                 # [batch, num_rel]
    jax.block_until_ready(score)
    assert score.shape == (batch, num_rel)
    print("KERNEL_OK")
</pallas_src>

<mosaic_0001>
module attributes {stable_mosaic.version = 11 : i64} {
  func.func @rel_proj_kernel(%arg0: i32, %arg1: memref<8x128xbf16, #tpu.memory_space<vmem>>, %arg2: memref<128x128xbf16, #tpu.memory_space<vmem>>, %arg3: memref<8x128xbf16, #tpu.memory_space<vmem>>) attributes {dimension_semantics = [#tpu.dimension_semantics<arbitrary>], iteration_bounds = array<i64: 1>, scalar_prefetch = 0 : i64, scratch_operands = 0 : i64, tpu.core_type = #tpu.core_type<tc>, window_params = [{pipeline_mode = #tpu.pipeline_mode<synchronous>, transform_indices = @transform_0, window_bounds = array<i64: 8, 128>}, {pipeline_mode = #tpu.pipeline_mode<synchronous>, transform_indices = @transform_1, window_bounds = array<i64: 128, 128>}, {pipeline_mode = #tpu.pipeline_mode<synchronous>, transform_indices = @transform_2, window_bounds = array<i64: 8, 128>}]} {
    %c0 = arith.constant 0 : index
    %c0_0 = arith.constant 0 : index
    %0 = vector.load %arg1[%c0, %c0_0] : memref<8x128xbf16, #tpu.memory_space<vmem>>, vector<8x128xbf16>
    %c0_1 = arith.constant 0 : index
    %c0_2 = arith.constant 0 : index
    %1 = vector.load %arg2[%c0_1, %c0_2] : memref<128x128xbf16, #tpu.memory_space<vmem>>, vector<128x128xbf16>
    %cst = arith.constant dense<0.000000e+00> : vector<8x128xf32>
    %2 = tpu.matmul %0, %1, %cst {dimension_numbers = #tpu.dot_dimension_numbers<[1], [0], [0], [1], [0, 0, 1, 1], [], []>} : vector<8x128xbf16>, vector<128x128xbf16>, vector<8x128xf32> -> vector<8x128xf32>
    %3 = arith.truncf %2 : vector<8x128xf32> to vector<8x128xbf16>
    %c0_3 = arith.constant 0 : index
    %c0_4 = arith.constant 0 : index
    %4 = vector.load %arg3[%c0_3, %c0_4] : memref<8x128xbf16, #tpu.memory_space<vmem>>, vector<8x128xbf16>
    tpu.vector_store %arg3[%c0_3, %c0_4], %3 {strides = array<i32>} : memref<8x128xbf16, #tpu.memory_space<vmem>>, vector<8x128xbf16>,
    return
  }
  func.func @transform_0(%arg0: i32) -> (i32, i32) {
    %c0_i32 = arith.constant 0 : i32
    %c0_i32_0 = arith.constant 0 : i32
    %c0_i32_1 = arith.constant 0 : i32
    return %c0_i32, %c0_i32_0 : i32, i32
  }
  func.func @transform_1(%arg0: i32) -> (i32, i32) {
    %c0_i32 = arith.constant 0 : i32
    %c0_i32_0 = arith.constant 0 : i32
    %c0_i32_1 = arith.constant 0 : i32
    return %c0_i32, %c0_i32_0 : i32, i32
  }
  func.func @transform_2(%arg0: i32) -> (i32, i32) {
    %c0_i32 = arith.constant 0 : i32
    %c0_i32_0 = arith.constant 0 : i32
    %c0_i32_1 = arith.constant 0 : i32
    return %c0_i32, %c0_i32_0 : i32, i32
  }
}

module attributes {stable_mosaic.version = 11 : i64} {
  func.func @edge_message_kernel(%arg0: i32, %arg1: memref<512xi32, #tpu.memory_space<smem>>, %arg2: memref<128x1xi32, #tpu.memory_space<vmem>>, %arg3: memref<128x1xf32, #tpu.memory_space<vmem>>, %arg4: memref<8x128xbf16, #tpu.memory_space<vmem>>, %arg5: memref<256x128xf32, #tpu.memory_space<any>>, %arg6: memref<128x128xf32, #tpu.memory_space<vmem>>, %arg7: memref<128x128xf32, #tpu.memory_space<vmem>>, %arg8: memref<128x128xf32, #tpu.memory_space<vmem>>, %arg9: memref<2x!tpu.dma_semaphore, #tpu.memory_space<semaphore_mem>>) attributes {dimension_semantics = [#tpu.dimension_semantics<arbitrary>], iteration_bounds = array<i64: 4>, scalar_prefetch = 1 : i64, scratch_operands = 3 : i64, tpu.core_type = #tpu.core_type<tc>, window_params = [{transform_indices = @transform_0, window_bounds = array<i64: 128, 1>}, {transform_indices = @transform_1, window_bounds = array<i64: 128, 1>}, {pipeline_mode = #tpu.pipeline_mode<synchronous>, transform_indices = @transform_2, window_bounds = array<i64: 8, 128>}, {}, {transform_indices = @transform_4, window_bounds = array<i64: 128, 128>}]} {
    %c0_i32 = arith.constant 0 : i32
    %0 = arith.cmpi eq, %arg0, %c0_i32 : i32
    %1 = arith.extui %0 : i1 to i32
    %c0_i32_0 = arith.constant 0 : i32
    %2 = arith.cmpi ne, %1, %c0_i32_0 : i32
    scf.if %2 {
      %c0_i32_38 = arith.constant 0 : i32
      %c128_i32 = arith.constant 128 : i32
      %72 = arith.addi %c0_i32_38, %c128_i32 : i32
      %c1_i32_39 = arith.constant 1 : i32
      scf.for %arg10 = %c0_i32_38 to %72 step %c1_i32_39  : i32 {
        %c1_i32_41 = arith.constant 1 : i32
        %73 = arith.muli %arg10, %c1_i32_41 : i32
        %c0_i32_42 = arith.constant 0 : i32
        %74 = arith.addi %c0_i32_42, %73 : i32
        %c0_i32_43 = arith.constant 0 : i32
        %75 = arith.addi %c0_i32_43, %74 : i32
        %76 = arith.index_cast %75 : i32 to index
        %77 = memref.load %arg1[%76] : memref<512xi32, #tpu.memory_space<smem>>
        %c0_i32_44 = arith.constant 0 : i32
        %c0_i32_45 = arith.constant 0 : i32
        %78 = tpu.memref_slice %arg5[%77, %c0_i32_45] : memref<256x128xf32, #tpu.memory_space<any>> -> memref<1x128xf32, #tpu.memory_space<any>>
        %c0_i32_46 = arith.constant 0 : i32
        %79 = tpu.memref_slice %arg7[%74, %c0_i32_46] : memref<128x128xf32, #tpu.memory_space<vmem>> -> memref<1x128xf32, #tpu.memory_space<vmem>>
        %80 = tpu.memref_slice %arg9[%c0_i32_44] : memref<2x!tpu.dma_semaphore, #tpu.memory_space<semaphore_mem>> -> memref<1x!tpu.dma_semaphore, #tpu.memory_space<semaphore_mem>>
        %81 = tpu.memref_squeeze %80 : memref<1x!tpu.dma_semaphore, #tpu.memory_space<semaphore_mem>> -> memref<!tpu.dma_semaphore, #tpu.memory_space<semaphore_mem>>
        tpu.enqueue_dma source(%78 : memref<1x128xf32, #tpu.memory_space<any>>) target(%79 : memref<1x128xf32, #tpu.memory_space<vmem>>) target_semaphore(%81 : memref<!tpu.dma_semaphore, #tpu.memory_space<semaphore_mem>>)
      }
      %c128_i32_40 = arith.constant 128 : i32
    } else {
    }
    %c1_i32 = arith.constant 1 : i32
    %3 = arith.addi %arg0, %c1_i32 : i32
    %c4_i32 = arith.constant 4 : i32
    %4 = arith.cmpi slt, %3, %c4_i32 : i32
    %c2_i32 = arith.constant 2 : i32
    %c0_i32_1 = arith.constant 0 : i32
    %5 = arith.cmpi eq, %c2_i32, %c0_i32_1 : i32
    %c1_i32_2 = arith.constant 1 : i32
    %6 = arith.select %5, %c1_i32_2, %c2_i32 : i32
    %7 = arith.remsi %3, %6 : i32
    %c0_i32_3 = arith.constant 0 : i32
    %8 = arith.cmpi ne, %7, %c0_i32_3 : i32
    %c0_i32_4 = arith.constant 0 : i32
    %9 = arith.cmpi slt, %7, %c0_i32_4 : i32
    %c0_i32_5 = arith.constant 0 : i32
    %10 = arith.cmpi slt, %6, %c0_i32_5 : i32
    %11 = arith.xori %9, %10 : i1
    %12 = arith.andi %11, %8 : i1
    %13 = arith.addi %7, %6 : i32
    %14 = arith.select %12, %13, %7 : i32
    %c0_i32_6 = arith.constant 0 : i32
    %15 = arith.cmpi eq, %14, %c0_i32_6 : i32
    %16 = arith.andi %4, %15 : i1
    %17 = arith.extui %16 : i1 to i32
    %c0_i32_7 = arith.constant 0 : i32
    %18 = arith.cmpi ne, %17, %c0_i32_7 : i32
    scf.if %18 {
      %c128_i32 = arith.constant 128 : i32
      %72 = arith.muli %3, %c128_i32 : i32
      %c0_i32_38 = arith.constant 0 : i32
      %c128_i32_39 = arith.constant 128 : i32
      %73 = arith.addi %c0_i32_38, %c128_i32_39 : i32
      %c1_i32_40 = arith.constant 1 : i32
      scf.for %arg10 = %c0_i32_38 to %73 step %c1_i32_40  : i32 {
        %c1_i32_42 = arith.constant 1 : i32
        %74 = arith.muli %arg10, %c1_i32_42 : i32
        %c0_i32_43 = arith.constant 0 : i32
        %75 = arith.addi %c0_i32_43, %74 : i32
        %76 = arith.addi %72, %75 : i32
        %77 = arith.index_cast %76 : i32 to index
        %78 = memref.load %arg1[%77] : memref<512xi32, #tpu.memory_space<smem>>
        %c0_i32_44 = arith.constant 0 : i32
        %c0_i32_45 = arith.constant 0 : i32
        %79 = tpu.memref_slice %arg5[%78, %c0_i32_45] : memref<256x128xf32, #tpu.memory_space<any>> -> memref<1x128xf32, #tpu.memory_space<any>>
        %c0_i32_46 = arith.constant 0 : i32
        %80 = tpu.memref_slice %arg7[%75, %c0_i32_46] : memref<128x128xf32, #tpu.memory_space<vmem>> -> memref<1x128xf32, #tpu.memory_space<vmem>>
        %81 = tpu.memref_slice %arg9[%c0_i32_44] : memref<2x!tpu.dma_semaphore, #tpu.memory_space<semaphore_mem>> -> memref<1x!tpu.dma_semaphore, #tpu.memory_space<semaphore_mem>>
        %82 = tpu.memref_squeeze %81 : memref<1x!tpu.dma_semaphore, #tpu.memory_space<semaphore_mem>> -> memref<!tpu.dma_semaphore, #tpu.memory_space<semaphore_mem>>
        tpu.enqueue_dma source(%79 : memref<1x128xf32, #tpu.memory_space<any>>) target(%80 : memref<1x128xf32, #tpu.memory_space<vmem>>) target_semaphore(%82 : memref<!tpu.dma_semaphore, #tpu.memory_space<semaphore_mem>>)
      }
      %c128_i32_41 = arith.constant 128 : i32
    } else {
    }
    %c4_i32_8 = arith.constant 4 : i32
    %19 = arith.cmpi slt, %3, %c4_i32_8 : i32
    %c2_i32_9 = arith.constant 2 : i32
    %c0_i32_10 = arith.constant 0 : i32
    %20 = arith.cmpi eq, %c2_i32_9, %c0_i32_10 : i32
    %c1_i32_11 = arith.constant 1 : i32
    %21 = arith.select %20, %c1_i32_11, %c2_i32_9 : i32
    %22 = arith.remsi %3, %21 : i32
    %c0_i32_12 = arith.constant 0 : i32
    %23 = arith.cmpi ne, %22, %c0_i32_12 : i32
    %c0_i32_13 = arith.constant 0 : i32
    %24 = arith.cmpi slt, %22, %c0_i32_13 : i32
    %c0_i32_14 = arith.constant 0 : i32
    %25 = arith.cmpi slt, %21, %c0_i32_14 : i32
    %26 = arith.xori %24, %25 : i1
    %27 = arith.andi %26, %23 : i1
    %28 = arith.addi %22, %21 : i32
    %29 = arith.select %27, %28, %22 : i32
    %c1_i32_15 = arith.constant 1 : i32
    %30 = arith.cmpi eq, %29, %c1_i32_15 : i32
    %31 = arith.andi %19, %30 : i1
    %32 = arith.extui %31 : i1 to i32
    %c0_i32_16 = arith.constant 0 : i32
    %33 = arith.cmpi ne, %32, %c0_i32_16 : i32
    scf.if %33 {
      %c128_i32 = arith.constant 128 : i32
      %72 = arith.muli %3, %c128_i32 : i32
      %c0_i32_38 = arith.constant 0 : i32
      %c128_i32_39 = arith.constant 128 : i32
      %73 = arith.addi %c0_i32_38, %c128_i32_39 : i32
      %c1_i32_40 = arith.constant 1 : i32
      scf.for %arg10 = %c0_i32_38 to %73 step %c1_i32_40  : i32 {
        %c1_i32_42 = arith.constant 1 : i32
        %74 = arith.muli %arg10, %c1_i32_42 : i32
        %c0_i32_43 = arith.constant 0 : i32
        %75 = arith.addi %c0_i32_43, %74 : i32
        %76 = arith.addi %72, %75 : i32
        %77 = arith.index_cast %76 : i32 to index
        %78 = memref.load %arg1[%77] : memref<512xi32, #tpu.memory_space<smem>>
        %c1_i32_44 = arith.constant 1 : i32
        %c0_i32_45 = arith.constant 0 : i32
        %79 = tpu.memref_slice %arg5[%78, %c0_i32_45] : memref<256x128xf32, #tpu.memory_space<any>> -> memref<1x128xf32, #tpu.memory_space<any>>
        %c0_i32_46 = arith.constant 0 : i32
        %80 = tpu.memref_slice %arg8[%75, %c0_i32_46] : memref<128x128xf32, #tpu.memory_space<vmem>> -> memref<1x128xf32, #tpu.memory_space<vmem>>
        %81 = tpu.memref_slice %arg9[%c1_i32_44] : memref<2x!tpu.dma_semaphore, #tpu.memory_space<semaphore_mem>> -> memref<1x!tpu.dma_semaphore, #tpu.memory_space<semaphore_mem>>
        %82 = tpu.memref_squeeze %81 : memref<1x!tpu.dma_semaphore, #tpu.memory_space<semaphore_mem>> -> memref<!tpu.dma_semaphore, #tpu.memory_space<semaphore_mem>>
        tpu.enqueue_dma source(%79 : memref<1x128xf32, #tpu.memory_space<any>>) target(%80 : memref<1x128xf32, #tpu.memory_space<vmem>>) target_semaphore(%82 : memref<!tpu.dma_semaphore, #tpu.memory_space<semaphore_mem>>)
      }
      %c128_i32_41 = arith.constant 128 : i32
    } else {
    }
    %c0 = arith.constant 0 : index
    %c0_17 = arith.constant 0 : index
    %34 = vector.load %arg2[%c0, %c0_17] : memref<128x1xi32, #tpu.memory_space<vmem>>, vector<128x1xi32>
    %35 = tpu.iota {dimensions = array<i32: 1>} : vector<128x8xi32>
    %36 = vector.broadcast %34 : vector<128x1xi32> to vector<128x8xi32>
    %37 = arith.cmpi eq, %36, %35 : vector<128x8xi32>
    %38 = arith.extui %37 : vector<128x8xi1> to vector<128x8xi32>
    %39 = arith.sitofp %38 : vector<128x8xi32> to vector<128x8xf32>
    %40 = arith.truncf %39 : vector<128x8xf32> to vector<128x8xbf16>
    %c0_18 = arith.constant 0 : index
    %c0_19 = arith.constant 0 : index
    %41 = vector.load %arg4[%c0_18, %c0_19] : memref<8x128xbf16, #tpu.memory_space<vmem>>, vector<8x128xbf16>
    %cst = arith.constant dense<0.000000e+00> : vector<128x128xf32>
    %42 = tpu.matmul %40, %41, %cst {dimension_numbers = #tpu.dot_dimension_numbers<[1], [0], [0], [1], [0, 0, 1, 1], [], []>} : vector<128x8xbf16>, vector<8x128xbf16>, vector<128x128xf32> -> vector<128x128xf32>
    %c0_20 = arith.constant 0 : index
    %c0_21 = arith.constant 0 : index
    %43 = vector.load %arg3[%c0_20, %c0_21] : memref<128x1xf32, #tpu.memory_space<vmem>>, vector<128x1xf32>
    %44 = vector.broadcast %43 : vector<128x1xf32> to vector<128x128xf32>
    %45 = arith.mulf %42, %44 : vector<128x128xf32>
    %c2_i32_22 = arith.constant 2 : i32
    %c0_i32_23 = arith.constant 0 : i32
    %46 = arith.cmpi eq, %c2_i32_22, %c0_i32_23 : i32
    %c1_i32_24 = arith.constant 1 : i32
    %47 = arith.select %46, %c1_i32_24, %c2_i32_22 : i32
    %48 = arith.remsi %arg0, %47 : i32
    %c0_i32_25 = arith.constant 0 : i32
    %49 = arith.cmpi ne, %48, %c0_i32_25 : i32
    %c0_i32_26 = arith.constant 0 : i32
    %50 = arith.cmpi slt, %48, %c0_i32_26 : i32
    %c0_i32_27 = arith.constant 0 : i32
    %51 = arith.cmpi slt, %47, %c0_i32_27 : i32
    %52 = arith.xori %50, %51 : i1
    %53 = arith.andi %52, %49 : i1
    %54 = arith.addi %48, %47 : i32
    %55 = arith.select %53, %54, %48 : i32
    %c0_i32_28 = arith.constant 0 : i32
    %56 = arith.cmpi eq, %55, %c0_i32_28 : i32
    %57 = arith.extui %56 : i1 to i32
    %c0_i32_29 = arith.constant 0 : i32
    %58 = arith.cmpi ne, %57, %c0_i32_29 : i32
    scf.if %58 {
      %c0_i32_38 = arith.constant 0 : i32
      %c128_i32 = arith.constant 128 : i32
      %72 = arith.addi %c0_i32_38, %c128_i32 : i32
      %c1_i32_39 = arith.constant 1 : i32
      scf.for %arg10 = %c0_i32_38 to %72 step %c1_i32_39  : i32 {
        %c1_i32_45 = arith.constant 1 : i32
        %76 = arith.muli %arg10, %c1_i32_45 : i32
        %c0_i32_46 = arith.constant 0 : i32
        %77 = arith.addi %c0_i32_46, %76 : i32
        %c0_i32_47 = arith.constant 0 : i32
        %c0_i32_48 = arith.constant 0 : i32
        %c0_i32_49 = arith.constant 0 : i32
        %78 = tpu.memref_slice %arg5[%c0_i32_48, %c0_i32_49] : memref<256x128xf32, #tpu.memory_space<any>> -> memref<1x128xf32, #tpu.memory_space<any>>
        %c0_i32_50 = arith.constant 0 : i32
        %79 = tpu.memref_slice %arg7[%77, %c0_i32_50] : memref<128x128xf32, #tpu.memory_space<vmem>> -> memref<1x128xf32, #tpu.memory_space<vmem>>
        %80 = tpu.memref_slice %arg9[%c0_i32_47] : memref<2x!tpu.dma_semaphore, #tpu.memory_space<semaphore_mem>> -> memref<1x!tpu.dma_semaphore, #tpu.memory_space<semaphore_mem>>
        %81 = tpu.memref_squeeze %80 : memref<1x!tpu.dma_semaphore, #tpu.memory_space<semaphore_mem>> -> memref<!tpu.dma_semaphore, #tpu.memory_space<semaphore_mem>>
        tpu.wait_dma2 semaphore(%81 : memref<!tpu.dma_semaphore, #tpu.memory_space<semaphore_mem>>) src(%78 : memref<1x128xf32, #tpu.memory_space<any>>) dst(%79 : memref<1x128xf32, #tpu.memory_space<vmem>>)
      }
      %c128_i32_40 = arith.constant 128 : i32
      %c0_41 = arith.constant 0 : index
      %c0_42 = arith.constant 0 : index
      %73 = vector.load %arg7[%c0_41, %c0_42] : memref<128x128xf32, #tpu.memory_space<vmem>>, vector<128x128xf32>
      %74 = arith.mulf %73, %45 : vector<128x128xf32>
      %c0_43 = arith.constant 0 : index
      %c0_44 = arith.constant 0 : index
      %75 = vector.load %arg6[%c0_43, %c0_44] : memref<128x128xf32, #tpu.memory_space<vmem>>, vector<128x128xf32>
      tpu.vector_store %arg6[%c0_43, %c0_44], %74 {strides = array<i32>} : memref<128x128xf32, #tpu.memory_space<vmem>>, vector<128x128xf32>,
    } else {
    }
    %c2_i32_30 = arith.constant 2 : i32
    %c0_i32_31 = arith.constant 0 : i32
    %59 = arith.cmpi eq, %c2_i32_30, %c0_i32_31 : i32
    %c1_i32_32 = arith.constant 1 : i32
    %60 = arith.select %59, %c1_i32_32, %c2_i32_30 : i32
    %61 = arith.remsi %arg0, %60 : i32
    %c0_i32_33 = arith.constant 0 : i32
    %62 = arith.cmpi ne, %61, %c0_i32_33 : i32
    %c0_i32_34 = arith.constant 0 : i32
    %63 = arith.cmpi slt, %61, %c0_i32_34 : i32
    %c0_i32_35 = arith.constant 0 : i32
    %64 = arith.cmpi slt, %60, %c0_i32_35 : i32
    %65 = arith.xori %63, %64 : i1
    %66 = arith.andi %65, %62 : i1
    %67 = arith.addi %61, %60 : i32
    %68 = arith.select %66, %67, %61 : i32
    %c1_i32_36 = arith.constant 1 : i32
    %69 = arith.cmpi eq, %68, %c1_i32_36 : i32
    %70 = arith.extui %69 : i1 to i32
    %c0_i32_37 = arith.constant 0 : i32
    %71 = arith.cmpi ne, %70, %c0_i32_37 : i32
    scf.if %71 {
      %c0_i32_38 = arith.constant 0 : i32
      %c128_i32 = arith.constant 128 : i32
      %72 = arith.addi %c0_i32_38, %c128_i32 : i32
      %c1_i32_39 = arith.constant 1 : i32
      scf.for %arg10 = %c0_i32_38 to %72 step %c1_i32_39  : i32 {
        %c1_i32_45 = arith.constant 1 : i32
        %76 = arith.muli %arg10, %c1_i32_45 : i32
        %c0_i32_46 = arith.constant 0 : i32
        %77 = arith.addi %c0_i32_46, %76 : i32
        %c1_i32_47 = arith.constant 1 : i32
        %c0_i32_48 = arith.constant 0 : i32
        %c0_i32_49 = arith.constant 0 : i32
        %78 = tpu.memref_slice %arg5[%c0_i32_48, %c0_i32_49] : memref<256x128xf32, #tpu.memory_space<any>> -> memref<1x128xf32, #tpu.memory_space<any>>
        %c0_i32_50 = arith.constant 0 : i32
        %79 = tpu.memref_slice %arg8[%77, %c0_i32_50] : memref<128x128xf32, #tpu.memory_space<vmem>> -> memref<1x128xf32, #tpu.memory_space<vmem>>
        %80 = tpu.memref_slice %arg9[%c1_i32_47] : memref<2x!tpu.dma_semaphore, #tpu.memory_space<semaphore_mem>> -> memref<1x!tpu.dma_semaphore, #tpu.memory_space<semaphore_mem>>
        %81 = tpu.memref_squeeze %80 : memref<1x!tpu.dma_semaphore, #tpu.memory_space<semaphore_mem>> -> memref<!tpu.dma_semaphore, #tpu.memory_space<semaphore_mem>>
        tpu.wait_dma2 semaphore(%81 : memref<!tpu.dma_semaphore, #tpu.memory_space<semaphore_mem>>) src(%78 : memref<1x128xf32, #tpu.memory_space<any>>) dst(%79 : memref<1x128xf32, #tpu.memory_space<vmem>>)
      }
      %c128_i32_40 = arith.constant 128 : i32
      %c0_41 = arith.constant 0 : index
      %c0_42 = arith.constant 0 : index
      %73 = vector.load %arg8[%c0_41, %c0_42] : memref<128x128xf32, #tpu.memory_space<vmem>>, vector<128x128xf32>
      %74 = arith.mulf %73, %45 : vector<128x128xf32>
      %c0_43 = arith.constant 0 : index
      %c0_44 = arith.constant 0 : index
      %75 = vector.load %arg6[%c0_43, %c0_44] : memref<128x128xf32, #tpu.memory_space<vmem>>, vector<128x128xf32>
      tpu.vector_store %arg6[%c0_43, %c0_44], %74 {strides = array<i32>} : memref<128x128xf32, #tpu.memory_space<vmem>>, vector<128x128xf32>,
    } else {
    }
    return
  }
  func.func @transform_0(%arg0: i32, %arg1: memref<512xi32, #tpu.memory_space<smem>>) -> (i32, i32) {
    %c0_i32 = arith.constant 0 : i32
    %c0_i32_0 = arith.constant 0 : i32
    return %arg0, %c0_i32 : i32, i32
  }
  func.func @transform_1(%arg0: i32, %arg1: memref<512xi32, #tpu.memory_space<smem>>) -> (i32, i32) {
    %c0_i32 = arith.constant 0 : i32
    %c0_i32_0 = arith.constant 0 : i32
    return %arg0, %c0_i32 : i32, i32
  }
  func.func @transform_2(%arg0: i32, %arg1: memref<512xi32, #tpu.memory_space<smem>>) -> (i32, i32) {
    %c0_i32 = arith.constant 0 : i32
    %c0_i32_0 = arith.constant 0 : i32
    %c0_i32_1 = arith.constant 0 : i32
    return %c0_i32, %c0_i32_0 : i32, i32
  }
  func.func @transform_4(%arg0: i32, %arg1: memref<512xi32, #tpu.memory_space<smem>>) -> (i32, i32) {
    %c0_i32 = arith.constant 0 : i32
    %c0_i32_0 = arith.constant 0 : i32
    return %arg0, %c0_i32 : i32, i32
  }
}

module attributes {stable_mosaic.version = 11 : i64} {
  func.func @combine_kernel(%arg0: i32, %arg1: memref<128x128xf32, #tpu.memory_space<vmem>>, %arg2: memref<128x128xbf16, #tpu.memory_space<vmem>>, %arg3: memref<1x128xf32, #tpu.memory_space<vmem>>, %arg4: memref<128x128xf32, #tpu.memory_space<vmem>>) attributes {dimension_semantics = [#tpu.dimension_semantics<parallel>], iteration_bounds = array<i64: 2>, scalar_prefetch = 0 : i64, scratch_operands = 0 : i64, tpu.core_type = #tpu.core_type<tc>, window_params = [{transform_indices = @transform_0, window_bounds = array<i64: 128, 128>}, {pipeline_mode = #tpu.pipeline_mode<synchronous>, transform_indices = @transform_1, window_bounds = array<i64: 128, 128>}, {pipeline_mode = #tpu.pipeline_mode<synchronous>, transform_indices = @transform_2, window_bounds = array<i64: 1, 128>}, {transform_indices = @transform_3, window_bounds = array<i64: 128, 128>}]} {
    %c0 = arith.constant 0 : index
    %c0_0 = arith.constant 0 : index
    %0 = vector.load %arg1[%c0, %c0_0] : memref<128x128xf32, #tpu.memory_space<vmem>>, vector<128x128xf32>
    %1 = arith.truncf %0 : vector<128x128xf32> to vector<128x128xbf16>
    %c0_1 = arith.constant 0 : index
    %c0_2 = arith.constant 0 : index
    %2 = vector.load %arg2[%c0_1, %c0_2] : memref<128x128xbf16, #tpu.memory_space<vmem>>, vector<128x128xbf16>
    %cst = arith.constant dense<0.000000e+00> : vector<128x128xf32>
    %3 = tpu.matmul %1, %2, %cst {dimension_numbers = #tpu.dot_dimension_numbers<[1], [0], [0], [1], [0, 0, 1, 1], [], []>} : vector<128x128xbf16>, vector<128x128xbf16>, vector<128x128xf32> -> vector<128x128xf32>
    %c0_3 = arith.constant 0 : index
    %c0_4 = arith.constant 0 : index
    %4 = vector.load %arg3[%c0_3, %c0_4] : memref<1x128xf32, #tpu.memory_space<vmem>>, vector<1x128xf32>
    %5 = vector.broadcast %4 : vector<1x128xf32> to vector<128x128xf32>
    %6 = arith.addf %3, %5 : vector<128x128xf32>
    %7 = math.tanh %6 : vector<128x128xf32>
    %c0_5 = arith.constant 0 : index
    %c0_6 = arith.constant 0 : index
    %8 = vector.load %arg4[%c0_5, %c0_6] : memref<128x128xf32, #tpu.memory_space<vmem>>, vector<128x128xf32>
    tpu.vector_store %arg4[%c0_5, %c0_6], %7 {strides = array<i32>} : memref<128x128xf32, #tpu.memory_space<vmem>>, vector<128x128xf32>,
    return
  }
  func.func @transform_0(%arg0: i32) -> (i32, i32) {
    %c0_i32 = arith.constant 0 : i32
    %c0_i32_0 = arith.constant 0 : i32
    return %arg0, %c0_i32 : i32, i32
  }
  func.func @transform_1(%arg0: i32) -> (i32, i32) {
    %c0_i32 = arith.constant 0 : i32
    %c0_i32_0 = arith.constant 0 : i32
    %c0_i32_1 = arith.constant 0 : i32
    return %c0_i32, %c0_i32_0 : i32, i32
  }
  func.func @transform_2(%arg0: i32) -> (i32, i32) {
    %c0_i32 = arith.constant 0 : i32
    %c0_i32_0 = arith.constant 0 : i32
    %c0_i32_1 = arith.constant 0 : i32
    return %c0_i32, %c0_i32_0 : i32, i32
  }
  func.func @transform_3(%arg0: i32) -> (i32, i32) {
    %c0_i32 = arith.constant 0 : i32
    %c0_i32_0 = arith.constant 0 : i32
    return %arg0, %c0_i32 : i32, i32
  }
}

module attributes {stable_mosaic.version = 11 : i64} {
  func.func @score_kernel(%arg0: i32, %arg1: memref<128xi32, #tpu.memory_space<smem>>, %arg2: memref<128xi32, #tpu.memory_space<smem>>, %arg3: memref<256x128xf32, #tpu.memory_space<any>>, %arg4: memref<128x128xbf16, #tpu.memory_space<vmem>>, %arg5: memref<1x128xf32, #tpu.memory_space<vmem>>, %arg6: memref<128x128xf32, #tpu.memory_space<vmem>>, %arg7: memref<128x128xf32, #tpu.memory_space<vmem>>, %arg8: memref<128x128xf32, #tpu.memory_space<vmem>>, %arg9: memref<2x!tpu.dma_semaphore, #tpu.memory_space<semaphore_mem>>) attributes {dimension_semantics = [#tpu.dimension_semantics<parallel>], iteration_bounds = array<i64: 1>, scalar_prefetch = 2 : i64, scratch_operands = 3 : i64, tpu.core_type = #tpu.core_type<tc>, window_params = [{}, {pipeline_mode = #tpu.pipeline_mode<synchronous>, transform_indices = @transform_1, window_bounds = array<i64: 128, 128>}, {pipeline_mode = #tpu.pipeline_mode<synchronous>, transform_indices = @transform_2, window_bounds = array<i64: 1, 128>}, {transform_indices = @transform_3, window_bounds = array<i64: 128, 128>}]} {
    %c128_i32 = arith.constant 128 : i32
    %0 = arith.muli %arg0, %c128_i32 : i32
    %c0_i32 = arith.constant 0 : i32
    %c128_i32_0 = arith.constant 128 : i32
    %1 = arith.addi %c0_i32, %c128_i32_0 : i32
    %c1_i32 = arith.constant 1 : i32
    scf.for %arg10 = %c0_i32 to %1 step %c1_i32  : i32 {
      %c1_i32_15 = arith.constant 1 : i32
      %13 = arith.muli %arg10, %c1_i32_15 : i32
      %c0_i32_16 = arith.constant 0 : i32
      %14 = arith.addi %c0_i32_16, %13 : i32
      %15 = arith.addi %0, %14 : i32
      %16 = arith.index_cast %15 : i32 to index
      %17 = memref.load %arg1[%16] : memref<128xi32, #tpu.memory_space<smem>>
      %c0_i32_17 = arith.constant 0 : i32
      %c0_i32_18 = arith.constant 0 : i32
      %18 = tpu.memref_slice %arg3[%17, %c0_i32_18] : memref<256x128xf32, #tpu.memory_space<any>> -> memref<1x128xf32, #tpu.memory_space<any>>
      %c0_i32_19 = arith.constant 0 : i32
      %19 = tpu.memref_slice %arg7[%14, %c0_i32_19] : memref<128x128xf32, #tpu.memory_space<vmem>> -> memref<1x128xf32, #tpu.memory_space<vmem>>
      %20 = tpu.memref_slice %arg9[%c0_i32_17] : memref<2x!tpu.dma_semaphore, #tpu.memory_space<semaphore_mem>> -> memref<1x!tpu.dma_semaphore, #tpu.memory_space<semaphore_mem>>
      %21 = tpu.memref_squeeze %20 : memref<1x!tpu.dma_semaphore, #tpu.memory_space<semaphore_mem>> -> memref<!tpu.dma_semaphore, #tpu.memory_space<semaphore_mem>>
      tpu.enqueue_dma source(%18 : memref<1x128xf32, #tpu.memory_space<any>>) target(%19 : memref<1x128xf32, #tpu.memory_space<vmem>>) target_semaphore(%21 : memref<!tpu.dma_semaphore, #tpu.memory_space<semaphore_mem>>)
      %22 = arith.addi %0, %14 : i32
      %23 = arith.index_cast %22 : i32 to index
      %24 = memref.load %arg2[%23] : memref<128xi32, #tpu.memory_space<smem>>
      %c1_i32_20 = arith.constant 1 : i32
      %c0_i32_21 = arith.constant 0 : i32
      %25 = tpu.memref_slice %arg3[%24, %c0_i32_21] : memref<256x128xf32, #tpu.memory_space<any>> -> memref<1x128xf32, #tpu.memory_space<any>>
      %c0_i32_22 = arith.constant 0 : i32
      %26 = tpu.memref_slice %arg8[%14, %c0_i32_22] : memref<128x128xf32, #tpu.memory_space<vmem>> -> memref<1x128xf32, #tpu.memory_space<vmem>>
      %27 = tpu.memref_slice %arg9[%c1_i32_20] : memref<2x!tpu.dma_semaphore, #tpu.memory_space<semaphore_mem>> -> memref<1x!tpu.dma_semaphore, #tpu.memory_space<semaphore_mem>>
      %28 = tpu.memref_squeeze %27 : memref<1x!tpu.dma_semaphore, #tpu.memory_space<semaphore_mem>> -> memref<!tpu.dma_semaphore, #tpu.memory_space<semaphore_mem>>
      tpu.enqueue_dma source(%25 : memref<1x128xf32, #tpu.memory_space<any>>) target(%26 : memref<1x128xf32, #tpu.memory_space<vmem>>) target_semaphore(%28 : memref<!tpu.dma_semaphore, #tpu.memory_space<semaphore_mem>>)
    }
    %c128_i32_1 = arith.constant 128 : i32
    %c0_i32_2 = arith.constant 0 : i32
    %c128_i32_3 = arith.constant 128 : i32
    %2 = arith.addi %c0_i32_2, %c128_i32_3 : i32
    %c1_i32_4 = arith.constant 1 : i32
    scf.for %arg10 = %c0_i32_2 to %2 step %c1_i32_4  : i32 {
      %c1_i32_15 = arith.constant 1 : i32
      %13 = arith.muli %arg10, %c1_i32_15 : i32
      %c0_i32_16 = arith.constant 0 : i32
      %14 = arith.addi %c0_i32_16, %13 : i32
      %c0_i32_17 = arith.constant 0 : i32
      %c0_i32_18 = arith.constant 0 : i32
      %c0_i32_19 = arith.constant 0 : i32
      %15 = tpu.memref_slice %arg3[%c0_i32_18, %c0_i32_19] : memref<256x128xf32, #tpu.memory_space<any>> -> memref<1x128xf32, #tpu.memory_space<any>>
      %c0_i32_20 = arith.constant 0 : i32
      %16 = tpu.memref_slice %arg7[%14, %c0_i32_20] : memref<128x128xf32, #tpu.memory_space<vmem>> -> memref<1x128xf32, #tpu.memory_space<vmem>>
      %17 = tpu.memref_slice %arg9[%c0_i32_17] : memref<2x!tpu.dma_semaphore, #tpu.memory_space<semaphore_mem>> -> memref<1x!tpu.dma_semaphore, #tpu.memory_space<semaphore_mem>>
      %18 = tpu.memref_squeeze %17 : memref<1x!tpu.dma_semaphore, #tpu.memory_space<semaphore_mem>> -> memref<!tpu.dma_semaphore, #tpu.memory_space<semaphore_mem>>
      tpu.wait_dma2 semaphore(%18 : memref<!tpu.dma_semaphore, #tpu.memory_space<semaphore_mem>>) src(%15 : memref<1x128xf32, #tpu.memory_space<any>>) dst(%16 : memref<1x128xf32, #tpu.memory_space<vmem>>)
      %c1_i32_21 = arith.constant 1 : i32
      %c0_i32_22 = arith.constant 0 : i32
      %c0_i32_23 = arith.constant 0 : i32
      %19 = tpu.memref_slice %arg3[%c0_i32_22, %c0_i32_23] : memref<256x128xf32, #tpu.memory_space<any>> -> memref<1x128xf32, #tpu.memory_space<any>>
      %c0_i32_24 = arith.constant 0 : i32
      %20 = tpu.memref_slice %arg8[%14, %c0_i32_24] : memref<128x128xf32, #tpu.memory_space<vmem>> -> memref<1x128xf32, #tpu.memory_space<vmem>>
      %21 = tpu.memref_slice %arg9[%c1_i32_21] : memref<2x!tpu.dma_semaphore, #tpu.memory_space<semaphore_mem>> -> memref<1x!tpu.dma_semaphore, #tpu.memory_space<semaphore_mem>>
      %22 = tpu.memref_squeeze %21 : memref<1x!tpu.dma_semaphore, #tpu.memory_space<semaphore_mem>> -> memref<!tpu.dma_semaphore, #tpu.memory_space<semaphore_mem>>
      tpu.wait_dma2 semaphore(%22 : memref<!tpu.dma_semaphore, #tpu.memory_space<semaphore_mem>>) src(%19 : memref<1x128xf32, #tpu.memory_space<any>>) dst(%20 : memref<1x128xf32, #tpu.memory_space<vmem>>)
    }
    %c128_i32_5 = arith.constant 128 : i32
    %c0 = arith.constant 0 : index
    %c0_6 = arith.constant 0 : index
    %3 = vector.load %arg7[%c0, %c0_6] : memref<128x128xf32, #tpu.memory_space<vmem>>, vector<128x128xf32>
    %c0_7 = arith.constant 0 : index
    %c0_8 = arith.constant 0 : index
    %4 = vector.load %arg8[%c0_7, %c0_8] : memref<128x128xf32, #tpu.memory_space<vmem>>, vector<128x128xf32>
    %5 = arith.mulf %3, %4 : vector<128x128xf32>
    %6 = arith.truncf %5 : vector<128x128xf32> to vector<128x128xbf16>
    %c0_9 = arith.constant 0 : index
    %c0_10 = arith.constant 0 : index
    %7 = vector.load %arg4[%c0_9, %c0_10] : memref<128x128xbf16, #tpu.memory_space<vmem>>, vector<128x128xbf16>
    %cst = arith.constant dense<0.000000e+00> : vector<128x128xf32>
    %8 = tpu.matmul %6, %7, %cst {dimension_numbers = #tpu.dot_dimension_numbers<[1], [0], [0], [1], [0, 0, 1, 1], [], []>} : vector<128x128xbf16>, vector<128x128xbf16>, vector<128x128xf32> -> vector<128x128xf32>
    %c0_11 = arith.constant 0 : index
    %c0_12 = arith.constant 0 : index
    %9 = vector.load %arg5[%c0_11, %c0_12] : memref<1x128xf32, #tpu.memory_space<vmem>>, vector<1x128xf32>
    %10 = vector.broadcast %9 : vector<1x128xf32> to vector<128x128xf32>
    %11 = arith.addf %8, %10 : vector<128x128xf32>
    %c0_13 = arith.constant 0 : index
    %c0_14 = arith.constant 0 : index
    %12 = vector.load %arg6[%c0_13, %c0_14] : memref<128x128xf32, #tpu.memory_space<vmem>>, vector<128x128xf32>
    tpu.vector_store %arg6[%c0_13, %c0_14], %11 {strides = array<i32>} : memref<128x128xf32, #tpu.memory_space<vmem>>, vector<128x128xf32>,
    return
  }
  func.func @transform_1(%arg0: i32, %arg1: memref<128xi32, #tpu.memory_space<smem>>, %arg2: memref<128xi32, #tpu.memory_space<smem>>) -> (i32, i32) {
    %c0_i32 = arith.constant 0 : i32
    %c0_i32_0 = arith.constant 0 : i32
    %c0_i32_1 = arith.constant 0 : i32
    return %c0_i32, %c0_i32_0 : i32, i32
  }
  func.func @transform_2(%arg0: i32, %arg1: memref<128xi32, #tpu.memory_space<smem>>, %arg2: memref<128xi32, #tpu.memory_space<smem>>) -> (i32, i32) {
    %c0_i32 = arith.constant 0 : i32
    %c0_i32_0 = arith.constant 0 : i32
    %c0_i32_1 = arith.constant 0 : i32
    return %c0_i32, %c0_i32_0 : i32, i32
  }
  func.func @transform_3(%arg0: i32, %arg1: memref<128xi32, #tpu.memory_space<smem>>, %arg2: memref<128xi32, #tpu.memory_space<smem>>) -> (i32, i32) {
    %c0_i32 = arith.constant 0 : i32
    %c0_i32_0 = arith.constant 0 : i32
    return %arg0, %c0_i32 : i32, i32
  }
}

</mosaic_0001>

<bundles_post_ra>
// kernel: forward.8
= control target key start
LH: loop header
LB: loop body
LE: loop exit
PB: predicated region body
PF: predicated region fallthrough
CT: control target
= control target key end

     0   :  { %7 = vsyncpa [#allocation3], 0  ;;  %s212_s9 = smov [#allocation2]   ;;  %s250_s0 = inlined_call_operand.vmem [shape: bf16[8,128], index: 0, kind: input, shape index: {}]   ;;  %s251_s1 = inlined_call_operand.hbm [shape: bf16[128,128], index: 1, kind: input, shape index: {}]   ;;  %s252_s2 = inlined_call_operand.vmem [shape: bf16[8,128], index: 2, kind: output, shape index: {}]  }
   0x1   :  { %s15_s10 = sshll.u32 %s212_s9, 4  ;;  %s188_s13 = scalar_lea.hbm %s251_s1, 1024  ;;  %s16_s10 = int_to_ptr.vmem [resolvable:$true] %s15_s10 }
   0x2   :  { %p189_p0 = scmp.ne.s32.totalorder %s251_s1, %s188_s13  ;;  %p192_p1 = scmp.lt.u32.totalorder %s188_s13, %s251_s1 }
   0x4   :  { %p194_p2 = pnand %p192_p1, %p189_p0 }
   0x6   :  { %197 = shalt.err (!%p194_p2)
}
   0x7   :  { %s198_s18 = scalar_lea.vmem %s16_s10, 1024  ;;  %p203_p4 = scmp.lt.s32.totalorder %s16_s10, %s16_s10 }
   0x8   :  { %p199_p3 = scmp.ne.s32.totalorder %s16_s10, %s198_s18  ;;  %p204_p5 = scmp.lt.s32.totalorder %s198_s18, %s198_s18 }
   0xa   :  { %p205_p6 = por %p204_p5, %p203_p4 }
   0xc   :  { %p206_p7 = pnand %p205_p6, %p199_p3 }
   0xe   :  { %209 = shalt.err (!%p206_p7)
}
   0xf   :  { %s213_s19 = smov 64   ;;  %s214_s20 = smov 4  }
  0x10   :  { %21 = dma.hbm_to_vmem [thread:$0]  %s251_s1, 1024, %s16_s10, [#allocation3], %s213_s19, %s213_s19, %s214_s20  }
  0x11   :  { %210 = dma.done.wait [#allocation3], 1024  }
  0x12   :  { %211 = vsyncadd [#allocation3], 4294966272  ;;  %v215_v0 = vmov 0.0   ;;  %vm216_vm0 = vmmov 0   ;;  %v180_v1 = vld [vmem:[#allocation2] sm:$0xff]   ;;  %v181_v2 = vld [vmem:[#allocation2 + $0x8] sm:$0xff]  }
  0x13   :  { %155 = vmatprep.subr.bf16.mxu0 %v215_v0  ;;  %171 = vmatprep.mubr.msk.bf16.mxu0 %vm216_vm0, %v215_v0  ;;  %v182_v3 = vld [vmem:[#allocation2 + $0x10] sm:$0xff]   ;;  %v183_v4 = vld [vmem:[#allocation2 + $0x18] sm:$0xff]   ;;  %v184_v5 = vld [vmem:[#allocation2 + $0x20] sm:$0xff]  }
  0x14   :  { %156 = vmatpush3.bf16.msra.mxu0 %v180_v1  ;;  %v185_v6 = vld [vmem:[#allocation2 + $0x28] sm:$0xff]   ;;  %v186_v7 = vld [vmem:[#allocation2 + $0x30] sm:$0xff]   ;;  %v187_v8 = vld [vmem:[#allocation2 + $0x38] sm:$0xff]  }
  0x15   :  { %157 = vmatprep.subr.bf16.mxu0 %v215_v0  ;;  %v26_v9 = vld [vmem:[%s250_s0] sm:$0xf] }
  0x18   :  { %158 = vmatpush3.bf16.msra.mxu0 %v181_v2 }
  0x19   :  { %159 = vmatprep.subr.bf16.mxu0 %v215_v0 }
  0x1c   :  { %160 = vmatpush3.bf16.msra.mxu0 %v182_v3 }
  0x1d   :  { %161 = vmatprep.subr.bf16.mxu0 %v215_v0 }
  0x20   :  { %162 = vmatpush3.bf16.msra.mxu0 %v183_v4 }
  0x21   :  { %163 = vmatprep.subr.bf16.mxu0 %v215_v0 }
  0x24   :  { %164 = vmatpush3.bf16.msra.mxu0 %v184_v5 }
  0x25   :  { %165 = vmatprep.subr.bf16.mxu0 %v215_v0 }
  0x28   :  { %166 = vmatpush3.bf16.msra.mxu0 %v185_v6 }
  0x29   :  { %167 = vmatprep.subr.bf16.mxu0 %v215_v0 }
  0x2c   :  { %168 = vmatpush3.bf16.msra.mxu0 %v186_v7 }
  0x2d   :  { %169 = vmatprep.subr.bf16.mxu0 %v215_v0 }
  0x30   :  { %170 = vmatpush3.bf16.msra.mxu0 %v187_v8 }
  0x33   :  { %172 = vmatmul.mubr.bf16.vlgmr.msra.gmra.mrb[0].mxu0 %v26_v9 }
 0x106   :  { %v125_v10 = vpop.f32.mrb[0].mxu0 }
 0x107   :  { %v131_v11 = vpack.c.bf16 %v125_v10, %v125_v10  ;;  %v173_v12 = vpop.f32.mrb[1].mxu0 }
 0x108   :  { %v128_v13 = vpop.f32.mrb[2].mxu0 }
 0x109   :  { %132 = vst [vmem:[%s252_s2] sm:$0xf] %v131_v11  ;;  %v174_v14 = vpop.f32.mrb[3].mxu0 }
 0x10a   :  { %137 = vsyncpa [#allocation3], 1 }

// kernel: forward.6
= control target key start
LH: loop header
LB: loop body
LE: loop exit
PB: predicated region body
PF: predicated region fallthrough
CT: control target
= control target key end

     0   :  { %s1491_s0 = inlined_call_operand.vmem [shape: s32[512], index: 0, kind: input, shape index: {}]   ;;  %s1492_s1 = inlined_call_operand.vmem [shape: s32[512,1], index: 1, kind: input, shape index: {}]   ;;  %s1493_s2 = inlined_call_operand.vmem [shape: f32[512,1], index: 2, kind: input, shape index: {}]   ;;  %s1494_s3 = inlined_call_operand.vmem [shape: bf16[8,128], index: 3, kind: input, shape index: {}]   ;;  %s1495_s4 = inlined_call_operand.vmem [shape: f32[256,128], index: 4, kind: input, shape index: {}]   ;;  %s1496_s5 = inlined_call_operand.vmem [shape: f32[512,128], index: 5, kind: output, shape index: {}]  }
   0x1   :  { %s10_s20 = sshll.u32 %s1491_s0, 4  ;;  %s11_s20 = int_to_ptr.vmem [resolvable:$true] %s10_s20 }
   0x2   :  { %s1173_s21 = scalar_lea.vmem %s11_s20, 64  ;;  %p1178_p1 = scmp.lt.s32.totalorder %s11_s20, %s11_s20 }
   0x3   :  { %p1174_p0 = scmp.ne.s32.totalorder %s11_s20, %s1173_s21  ;;  %p1179_p2 = scmp.lt.s32.totalorder %s1173_s21, %s1173_s21 }
   0x5   :  { %p1180_p3 = por %p1179_p2, %p1178_p1 }
   0x7   :  { %p1181_p4 = pnand %p1180_p3, %p1174_p0 }
   0x9   :  { %1184 = shalt.err (!%p1181_p4)  }
   0xa   :  { %s1239_s22 = smov [#allocation6]  }
   0xb   :  { %13 = dma.vmem_to_smem %s11_s20, 64, %s1239_s22, [#allocation5] }
   0xc   :  { %1209 = dma.done.wait [#allocation5], 64 }
   0xd   :  { %1210 = vsyncadd [#allocation5], 4294967232 }
   0xe   :  { %15 = sfence }
   0xf   :  { %s1275_s23 = smov 0  }
  0x10 LB: > { %s1281_s0 = sadd.s32 4294967295, %s1217_s23   ;;  %p1039_p5 = scmp.ge.s32.totalorder %s1217_s23, 1  ;;  %s1217_s23 = sphi %s1275_s23, %s21_s23  }
  0x11   : > { %p157_p6 = scmp.lt.s32.totalorder %s1217_s23, 5 }
  0x13   : > { %p158_p7 = pnand %p1039_p5, %p157_p6 }
  0x14   : > { %s1040_s24 = sshll.u32 (!%p158_p7), %s1281_s0, 4  ;;  %p1046_p9 = scmp.ne.s32.totalorder (!%p158_p7), %s1281_s0, 0 }
  0x15   : > { %161 = sbr.rel (%p158_p7) target bundleno = 540 (0x21c), region = 32  ;;  %p187_p8 = scmp.lt.s32.totalorder (!%p158_p7), %s1040_s24, 63 }
  0x1c   : > { %s1498_s24 = smov (!%p187_p8, %s1040_s24), 63  ;;  %208 = sbr.rel (%p1046_p9) target bundleno = 54 (0x36), region = 36 }
  0x1d   : > { %s1041_s25 = sshll.u32 %s1498_s24, 3  ;;  %s1219_s10 = smov (!%p1046_p9), 0  }
  0x1e   : > { %s1289_s28 = scalar_lea.vmem %s1492_s1, %s1041_s25  ;;  %s1294_s6 = scalar_lea.vmem %s1493_s2, %s1041_s25 }
  0x1f   : > { %s1299_s9 = scalar_lea.vmem %s1496_s5, %s1041_s25 }
  0x23 LB: >> { %s215_s11 = sld [smem:[#allocation6 + %s1221_s10]]  ;;  %s217_s15 = scalar_lea.vmem [#allocation2], %s1221_s10  ;;  %s1221_s10 = sphi %s1219_s10, %s214_s10  }
  0x29   : >> { %s216_s14 = scalar_lea.vmem %s1495_s4, %s215_s11 }
  0x2a   : >> { %v235_v0 = vld [vmem:[%s216_s14] sm:$0x1] }
  0x2b   : >> { %236 = vst [vmem:[%s217_s15] sm:$0x1] %v235_v0 }
  0x2c   : >> { %261 = vsyncadd [#allocation4], 16  ;;  %s214_s10 = sadd.s32 1, %s1221_s10  }
  0x2d   : >> { %p211_p10 = scmp.ge.s32.totalorder %s214_s10, 128  }
  0x2f   : > { %213 = sbr.rel (!%p211_p10) target bundleno = 35 (0x23), region = 249 }
  0x36 PF: > { %s1306_s16 = sadd.s32 1, %s1281_s0 }
  0x37   : > { %p264_p11 = scmp.lt.s32.totalorder %s1306_s16, 0  ;;  %s265_s17 = ssub.s32 0, %s1306_s16 }
  0x38   : > { %s1047_s18 = smin.u32 %s265_s17, %s1306_s16  ;;  %p263_p13 = scmp.lt.s32.totalorder %s1306_s16, 4 }
  0x39   : > { %s267_s19 = sand.u32 1, %s1047_s18  }
  0x3a   : > { %s268_s20 = ssub.s32 0, %s267_s19 }
  0x3b   : > { %s1500_s20 = smov (!%p264_p11, %s268_s20), %s267_s19 }
  0x3c   : > { %p1049_p12 = scmp.lt.s32.totalorder %s1500_s20, 0  ;;  %s274_s21 = sadd.s32 2, %s1500_s20 }
  0x3e   : > { %s1502_s21 = smov (!%p1049_p12, %s274_s21), %s1500_s20 }
  0x3f   : > { %p276_p0 = scmp.eq.s32.totalorder %s1502_s21, 0 }
  0x41   : > { %p277_p1 = pnand %p276_p0, %p263_p13 }
  0x42   : > { %s1085_s22 = sshll.u32 (!%p277_p1), %s1281_s0, 7  ;;  %s1223_s25 = smov (!%p277_p1), 0  }
  0x43   : > { %280 = sbr.rel (%p277_p1) target bundleno = 94 (0x5e), region = 77  ;;  %s1086_s24 = sadd.s32 (!%p277_p1), 128, %s1085_s22 }
  0x4a LB: >> { %s288_s26 = sadd.s32 %s1225_s25, %s1086_s24  ;;  %s291_s8 = scalar_lea.vmem [#allocation2], %s1225_s25  ;;  %s1225_s25 = sphi %s1223_s25, %s287_s25  }
  0x4b   : >> { %s289_s27 = sld [smem:[#allocation6 + %s288_s26]] }
  0x51   : >> { %s290_s7 = scalar_lea.vmem %s1495_s4, %s289_s27 }
  0x52   : >> { %v309_v1 = vld [vmem:[%s290_s7] sm:$0x1] }
  0x53   : >> { %310 = vst [vmem:[%s291_s8] sm:$0x1] %v309_v1 }
  0x54   : >> { %335 = vsyncadd [#allocation4], 16  ;;  %s287_s25 = sadd.s32 1, %s1225_s25  }
  0x55   : >> { %p284_p2 = scmp.ge.s32.totalorder %s287_s25, 128  }
  0x57   : > { %286 = sbr.rel (!%p284_p2) target bundleno = 74 (0x4a), region = 260 }
  0x5e PF: > { %p336_p3 = scmp.eq.s32.totalorder %s1502_s21, 1 }
  0x60   : > { %p337_p4 = pnand %p336_p3, %p263_p13 }
  0x61   : > { %s1087_s10 = sshll.u32 (!%p337_p4), %s1281_s0, 7  ;;  %s1227_s12 = smov (!%p337_p4), 0  }
  0x62   : > { %340 = sbr.rel (%p337_p4) target bundleno = 125 (0x7d), region = 118  ;;  %s1088_s11 = sadd.s32 (!%p337_p4), 128, %s1087_s10 }
  0x69 LB: >> { %s348_s13 = sadd.s32 %s1229_s12, %s1088_s11  ;;  %s351_s19 = scalar_lea.vmem [#allocation3], %s1229_s12  ;;  %s1229_s12 = sphi %s1227_s12, %s347_s12  }
  0x6a   : >> { %s349_s14 = sld [smem:[#allocation6 + %s348_s13]] }
  0x70   : >> { %s350_s18 = scalar_lea.vmem %s1495_s4, %s349_s14 }
  0x71   : >> { %v370_v2 = vld [vmem:[%s350_s18] sm:$0x1] }
  0x72   : >> { %371 = vst [vmem:[%s351_s19] sm:$0x1] %v370_v2 }
  0x73   : >> { %396 = vsyncadd [#allocation4 + $0x1], 16  ;;  %s347_s12 = sadd.s32 1, %s1229_s12  }
  0x74   : >> { %p344_p5 = scmp.ge.s32.totalorder %s347_s12, 128  }
  0x76   : > { %346 = sbr.rel (!%p344_p5) target bundleno = 105 (0x69), region = 271 }
  0x7d PF: > { %v405_v3 = vld [vmem:[%s1289_s28 + $0x40] sm:$0xff]  ;;  %v1240_v5 = vmov 0   ;;  %v406_v6 = vld [vmem:[%s1289_s28 + $0x48] sm:$0xff]  ;;  %v400_v8 = vld [vmem:[%s1289_s28 + $0x18] sm:$0xff]  ;;  %vm545_vm0 = vcmask 1043456   ;;  %v413_v38 = vlaneseq  ;;  %vm520_vm5 = vcmask 64512  }
  0x7e   : > { %v397_v4 = vld [vmem:[%s1289_s28] sm:$0xff]  ;;  %1172 = vset.pattern.permute.xlu1 %v1240_v5  ;;  %1171 = vset.pattern.permute.xlu0 %v1240_v5  ;;  %v398_v7 = vld [vmem:[%s1289_s28 + $0x8] sm:$0xff]  ;;  %v399_v9 = vld [vmem:[%s1289_s28 + $0x10] sm:$0xff]  ;;  %v1241_v44 = vmov 0.0   ;;  %p758_p6 = scmp.lt.s32.totalorder %s1281_s0, 0 }
  0x7f   : > { %440 = vperm.xlu1 %1172, %v405_v3   ;;  %416 = vperm.xlu0 %1171, %v397_v4   ;;  %v519_v10 = vld [vmem:[%s1494_s3] sm:$0xf]  ;;  %v408_v11 = vld [vmem:[%s1289_s28 + $0x58] sm:$0xff]  ;;  %v407_v12 = vld [vmem:[%s1289_s28 + $0x50] sm:$0xff]  ;;  %v1359_v39 = vand.u32 127, %v413_v38 }
  0x80   : > { %1118 = vmatprep.subr.msk.bf16.mxu0 %vm545_vm0, %v519_v10  ;;  %v547_v13 = vsel %vm545_vm0, %v519_v10, 0  ;;  %1119 = vmatprep.subr.msk.bf16.mxu1 %vm545_vm0, %v519_v10  ;;  %v402_v14 = vld [vmem:[%s1289_s28 + $0x28] sm:$0xff]  ;;  %v401_v15 = vld [vmem:[%s1289_s28 + $0x20] sm:$0xff]  ;;  %v404_v18 = vld [vmem:[%s1289_s28 + $0x38] sm:$0xff] }
  0x81   : > { %1099 = vmatpush3.bf16.msra.mxu0 %v547_v13  ;;  %1117 = vmatpush3.bf16.msra.mxu1 %v547_v13  ;;  %v410_v16 = vld [vmem:[%s1289_s28 + $0x68] sm:$0xff]  ;;  %v409_v17 = vld [vmem:[%s1289_s28 + $0x60] sm:$0xff]  ;;  %v403_v19 = vld [vmem:[%s1289_s28 + $0x30] sm:$0xff] }
  0x82   : > { %v412_v20 = vld [vmem:[%s1289_s28 + $0x78] sm:$0xff]  ;;  %v411_v21 = vld [vmem:[%s1289_s28 + $0x70] sm:$0xff]  ;;  %v647_v22 = vld [vmem:[%s1294_s6 + $0x8] sm:$0xff]  ;;  %s759_s28 = ssub.s32 0, %s1281_s0 }
  0x83   : > { %443 = vperm.xlu1 %1172, %v406_v6   ;;  %419 = vperm.xlu0 %1171, %v398_v7   ;;  %v646_v23 = vld [vmem:[%s1294_s6] sm:$0xff]  ;;  %v649_v24 = vld [vmem:[%s1294_s6 + $0x18] sm:$0xff]  ;;  %v648_v25 = vld [vmem:[%s1294_s6 + $0x10] sm:$0xff] }
  0x84   : > { %v651_v26 = vld [vmem:[%s1294_s6 + $0x28] sm:$0xff]  ;;  %v650_v27 = vld [vmem:[%s1294_s6 + $0x20] sm:$0xff]  ;;  %v653_v28 = vld [vmem:[%s1294_s6 + $0x38] sm:$0xff] }
  0x85   : > { %v652_v29 = vld [vmem:[%s1294_s6 + $0x30] sm:$0xff]  ;;  %v655_v30 = vld [vmem:[%s1294_s6 + $0x48] sm:$0xff]  ;;  %v654_v31 = vld [vmem:[%s1294_s6 + $0x40] sm:$0xff] }
  0x86   : > { %v657_v32 = vld [vmem:[%s1294_s6 + $0x58] sm:$0xff]  ;;  %v656_v33 = vld [vmem:[%s1294_s6 + $0x50] sm:$0xff]  ;;  %v659_v34 = vld [vmem:[%s1294_s6 + $0x68] sm:$0xff] }
  0x87   : > { %425 = vperm.xlu1 %1172, %v400_v8   ;;  %422 = vperm.xlu0 %1171, %v399_v9   ;;  %v658_v35 = vld [vmem:[%s1294_s6 + $0x60] sm:$0xff]  ;;  %v661_v36 = vld [vmem:[%s1294_s6 + $0x78] sm:$0xff]  ;;  %v660_v37 = vld [vmem:[%s1294_s6 + $0x70] sm:$0xff]  ;;  %s1076_s6 = smin.u32 %s1281_s0, %s759_s28 }
  0x88   : > { %s761_s21 = sand.u32 1, %s1076_s6  }
  0x89   : > { %s762_s22 = ssub.s32 0, %s761_s21 }
  0x8a   : > { %s1504_s22 = smov (!%p758_p6, %s762_s22), %s761_s21 }
  0x8b   : > { %449 = vperm.xlu1 %1172, %v408_v11   ;;  %446 = vperm.xlu0 %1171, %v407_v12   ;;  %p1078_p7 = scmp.lt.s32.totalorder %s1504_s22, 0  ;;  %s768_s24 = sadd.s32 2, %s1504_s22 }
  0x8d   : > { %s1506_s24 = smov (!%p1078_p7, %s768_s24), %s1504_s22 }
  0x8e   : > { %p1079_p8 = scmp.ne.s32.totalorder %s1506_s24, 0 }
  0x8f   : > { %431 = vperm.xlu1 %1172, %v402_v14   ;;  %428 = vperm.xlu0 %1171, %v401_v15   ;;  %s1231_s0 = smov (!%p1079_p8), 0  }
  0x93   : > { %455 = vperm.xlu1 %1172, %v410_v16   ;;  %452 = vperm.xlu0 %1171, %v409_v17  }
  0x97   : > { %437 = vperm.xlu1 %1172, %v404_v18   ;;  %434 = vperm.xlu0 %1171, %v403_v19  }
  0x9b   : > { %461 = vperm.xlu1 %1172, %v412_v20   ;;  %458 = vperm.xlu0 %1171, %v411_v21  }
  0x9f   : > { %669 = vperm.xlu1 %1172, %v647_v22   ;;  %664 = vperm.xlu0 %1171, %v646_v23  }
  0xa3   : > { %679 = vperm.xlu1 %1172, %v649_v24   ;;  %674 = vperm.xlu0 %1171, %v648_v25  }
  0xa7   : > { %689 = vperm.xlu1 %1172, %v651_v26   ;;  %684 = vperm.xlu0 %1171, %v650_v27  }
  0xab   : > { %699 = vperm.xlu1 %1172, %v653_v28   ;;  %694 = vperm.xlu0 %1171, %v652_v29  }
  0xaf   : > { %709 = vperm.xlu1 %1172, %v655_v30   ;;  %704 = vperm.xlu0 %1171, %v654_v31  }
  0xb3   : > { %719 = vperm.xlu1 %1172, %v657_v32   ;;  %714 = vperm.xlu0 %1171, %v656_v33  }
  0xb7   : > { %729 = vperm.xlu1 %1172, %v659_v34   ;;  %724 = vperm.xlu0 %1171, %v658_v35  }
  0xbb   : > { %739 = vperm.xlu1 %1172, %v661_v36   ;;  %734 = vperm.xlu0 %1171, %v660_v37  }
  0xfe   : > { %v441_v40 = vpop.permute.xlu1 %440  ;;  %v417_v41 = vpop.permute.xlu0 %416 }
  0xff   : > { %vm471_vm1 = vcmp.eq.s32.totalorder %v441_v40, %v1359_v39  ;;  %vm463_vm2 = vcmp.eq.s32.totalorder %v417_v41, %v1359_v39 }
 0x100   : > { %v1060_v45 = vsel %vm471_vm1, 1.0, %v1241_v44  ;;  %v1052_v46 = vsel %vm463_vm2, 1.0, %v1241_v44 }
 0x102   : > { %v444_v42 = vpop.permute.xlu1 %443  ;;  %v420_v43 = vpop.permute.xlu0 %419 }
 0x103   : > { %vm472_vm3 = vcmp.eq.s32.totalorder %v444_v42, %v1359_v39  ;;  %vm464_vm4 = vcmp.eq.s32.totalorder %v420_v43, %v1359_v39 }
 0x104   : > { %v1061_v47 = vsel %vm472_vm3, 1.0, %v1241_v44  ;;  %v1053_v48 = vsel %vm464_vm4, 1.0, %v1241_v44 }
 0x105   : > { %v511_v49 = vpack.c.bf16 %v1053_v48, %v1052_v46  ;;  %v515_v50 = vpack.c.bf16 %v1061_v47, %v1060_v45 }
 0x106   : > { %v426_v51 = vpop.permute.xlu1 %425  ;;  %v423_v52 = vpop.permute.xlu0 %422 }
 0x107   : > { %vm466_vm6 = vcmp.eq.s32.totalorder %v426_v51, %v1359_v39  ;;  %vm465_vm7 = vcmp.eq.s32.totalorder %v423_v52, %v1359_v39  ;;  %1100 = vmatprep.mubr.msk.bf16.mxu0 %vm520_vm5, %v511_v49  ;;  %1108 = vmatprep.mubr.msk.bf16.mxu1 %vm520_vm5, %v515_v50 }
 0x108   : > { %v1055_v53 = vsel %vm466_vm6, 1.0, %v1241_v44  ;;  %v1054_v54 = vsel %vm465_vm7, 1.0, %v1241_v44 }
 0x109   : > { %v512_v55 = vpack.c.bf16 %v1055_v53, %v1054_v54 }
 0x10a   : > { %v450_v56 = vpop.permute.xlu1 %449  ;;  %v447_v57 = vpop.permute.xlu0 %446 }
 0x10b   : > { %vm474_vm8 = vcmp.eq.s32.totalorder %v450_v56, %v1359_v39  ;;  %vm473_vm9 = vcmp.eq.s32.totalorder %v447_v57, %v1359_v39  ;;  %1101 = vmatmul.mubr.msk.bf16.vlgmr.msra.gmra.mrb[0].mxu0 %vm520_vm5, %v512_v55 }
 0x10c   : > { %v1063_v58 = vsel %vm474_vm8, 1.0, %v1241_v44  ;;  %v1062_v59 = vsel %vm473_vm9, 1.0, %v1241_v44 }
 0x10d   : > { %v516_v60 = vpack.c.bf16 %v1063_v58, %v1062_v59 }
 0x10e   : > { %v432_v61 = vpop.permute.xlu1 %431  ;;  %v429_v62 = vpop.permute.xlu0 %428 }
 0x10f   : > { %vm468_vm10 = vcmp.eq.s32.totalorder %v432_v61, %v1359_v39  ;;  %vm467_vm11 = vcmp.eq.s32.totalorder %v429_v62, %v1359_v39  ;;  %1109 = vmatmul.mubr.msk.bf16.vlgmr.msra.gmra.mrb[0].mxu1 %vm520_vm5, %v516_v60 }
 0x110   : > { %v1057_v63 = vsel %vm468_vm10, 1.0, %v1241_v44  ;;  %v1056_v0 = vsel %vm467_vm11, 1.0, %v1241_v44 }
 0x111   : > { %v513_v1 = vpack.c.bf16 %v1057_v63, %v1056_v0 }
 0x112   : > { %v456_v2 = vpop.permute.xlu1 %455  ;;  %v453_v3 = vpop.permute.xlu0 %452 }
 0x113   : > { %vm476_vm12 = vcmp.eq.s32.totalorder %v456_v2, %v1359_v39  ;;  %vm475_vm13 = vcmp.eq.s32.totalorder %v453_v3, %v1359_v39  ;;  %1104 = vmatprep.mubr.msk.bf16.mxu0 %vm520_vm5, %v513_v1 }
 0x114   : > { %v1065_v4 = vsel %vm476_vm12, 1.0, %v1241_v44  ;;  %v1064_v5 = vsel %vm475_vm13, 1.0, %v1241_v44 }
 0x115   : > { %v517_v6 = vpack.c.bf16 %v1065_v4, %v1064_v5 }
 0x116   : > { %v438_v7 = vpop.permute.xlu1 %437  ;;  %v435_v8 = vpop.permute.xlu0 %434 }
 0x117   : > { %vm470_vm14 = vcmp.eq.s32.totalorder %v438_v7, %v1359_v39  ;;  %vm469_vm15 = vcmp.eq.s32.totalorder %v435_v8, %v1359_v39  ;;  %1112 = vmatprep.mubr.msk.bf16.mxu1 %vm520_vm5, %v517_v6 }
 0x118   : > { %v1059_v9 = vsel %vm470_vm14, 1.0, %v1241_v44  ;;  %v1058_v10 = vsel %vm469_vm15, 1.0, %v1241_v44 }
 0x119   : > { %v514_v11 = vpack.c.bf16 %v1059_v9, %v1058_v10 }
 0x11a   : > { %v462_v12 = vpop.permute.xlu1 %461  ;;  %v459_v13 = vpop.permute.xlu0 %458 }
 0x11b   : > { %vm478_vm0 = vcmp.eq.s32.totalorder %v462_v12, %v1359_v39  ;;  %vm477_vm1 = vcmp.eq.s32.totalorder %v459_v13, %v1359_v39  ;;  %1105 = vmatmul.mubr.msk.bf16.gmra.mrb[4].mxu0 %vm520_vm5, %v514_v11 }
 0x11c   : > { %v1067_v14 = vsel %vm478_vm0, 1.0, %v1241_v44  ;;  %v1066_v15 = vsel %vm477_vm1, 1.0, %v1241_v44 }
 0x11d   : > { %v518_v16 = vpack.c.bf16 %v1067_v14, %v1066_v15 }
 0x11e   : > { %v665_v17 = vpop.permute.xlu0 %664  ;;  %v670_v18 = vpop.permute.xlu1 %669 }
 0x11f   : > { %1113 = vmatmul.mubr.msk.bf16.gmra.mrb[4].mxu1 %vm520_vm5, %v518_v16 }
 0x122   : > { %v675_v19 = vpop.permute.xlu0 %674  ;;  %v680_v20 = vpop.permute.xlu1 %679 }
 0x126   : > { %v685_v21 = vpop.permute.xlu0 %684  ;;  %v690_v22 = vpop.permute.xlu1 %689 }
 0x12a   : > { %v695_v23 = vpop.permute.xlu0 %694  ;;  %v700_v24 = vpop.permute.xlu1 %699 }
 0x12e   : > { %v705_v25 = vpop.permute.xlu0 %704  ;;  %v710_v26 = vpop.permute.xlu1 %709 }
 0x132   : > { %v715_v34 = vpop.permute.xlu0 %714  ;;  %v720_v39 = vpop.permute.xlu1 %719 }
 0x136   : > { %v725_v45 = vpop.permute.xlu0 %724  ;;  %v730_v46 = vpop.permute.xlu1 %729 }
 0x13a   : > { %v735_v54 = vpop.permute.xlu0 %734  ;;  %v740_v59 = vpop.permute.xlu1 %739 }
 0x1de   : > { %v1102_v27 = vpop.f32.mrb[0].mxu0 }
 0x1df   : > { %v1390_v28 = vmul.f32 %v1102_v27, %v675_v19  ;;  %v583_v29 = vpop.f32.mrb[1].mxu0 }
 0x1e0   : > { %v1392_v30 = vmul.f32 %v665_v17, %v583_v29  ;;  %v1103_v31 = vpop.f32.mrb[2].mxu0 }
 0x1e1   : > { %v1394_v32 = vmul.f32 %v1103_v31, %v680_v20  ;;  %v586_v33 = vpop.f32.mrb[3].mxu0 }
 0x1e2   : > { %v1396_v35 = vmul.f32 %v670_v18, %v586_v33  ;;  %v1110_v36 = vpop.f32.mrb[0].mxu1 }
 0x1e3   : > { %v1398_v37 = vmul.f32 %v1110_v36, %v715_v34  ;;  %v615_v38 = vpop.f32.mrb[1].mxu1 }
 0x1e4   : > { %v1400_v40 = vmul.f32 %v705_v25, %v615_v38  ;;  %v1111_v41 = vpop.f32.mrb[2].mxu1 }
 0x1e5   : > { %v1402_v42 = vmul.f32 %v1111_v41, %v720_v39  ;;  %v618_v43 = vpop.f32.mrb[3].mxu1 }
 0x1e6   : > { %v1404_v44 = vmul.f32 %v710_v26, %v618_v43 }
 0x1ee   : > { %v1106_v47 = vpop.f32.mrb[4].mxu0 }
 0x1ef   : > { %v1406_v48 = vmul.f32 %v1106_v47, %v695_v23  ;;  %v599_v49 = vpop.f32.mrb[5].mxu0 }
 0x1f0   : > { %v1408_v50 = vmul.f32 %v685_v21, %v599_v49  ;;  %v1107_v51 = vpop.f32.mrb[6].mxu0  ;;  %773 = sbr.rel (%p1079_p8) target bundleno = 517 (0x205), region = 159 }
 0x1f1   : > { %v1410_v52 = vmul.f32 %v1107_v51, %v700_v24  ;;  %v602_v53 = vpop.f32.mrb[7].mxu0 }
 0x1f2   : > { %v1412_v55 = vmul.f32 %v690_v22, %v602_v53  ;;  %v1114_v56 = vpop.f32.mrb[4].mxu1 }
 0x1f3   : > { %v1414_v57 = vmul.f32 %v1114_v56, %v735_v54  ;;  %v631_v58 = vpop.f32.mrb[5].mxu1 }
 0x1f4   : > { %v1416_v60 = vmul.f32 %v725_v45, %v631_v58  ;;  %v1115_v61 = vpop.f32.mrb[6].mxu1 }
 0x1f5   : > { %v1418_v62 = vmul.f32 %v1115_v61, %v740_v59  ;;  %v634_v63 = vpop.f32.mrb[7].mxu1 }
 0x1f6   : > { %v1420_v0 = vmul.f32 %v730_v46, %v634_v63 }
 0x1f7 LB: >> { %1211 = dma.done.wait [#allocation4], 16  ;;  %s1233_s0 = sphi %s1231_s0, %s779_s0  }
 0x1f8   : >> { %1212 = vsyncadd [#allocation4], 4294967280  ;;  %s779_s0 = sadd.s32 1, %s1233_s0  }
 0x1f9   : >> { %p776_p9 = scmp.ge.s32.totalorder %s779_s0, 128  }
 0x1fa   : > { %v783_v1 = vld [vmem:[#allocation2] sm:$0xff] (%p776_p9)  ;;  %v784_v2 = vld [vmem:[#allocation2 + $0x8] sm:$0xff] (%p776_p9)  ;;  %v785_v3 = vld [vmem:[#allocation2 + $0x10] sm:$0xff] (%p776_p9) }
 0x1fb   : > { %778 = sbr.rel (!%p776_p9) target bundleno = 503 (0x1f7), region = 282  ;;  %v799_v4 = vmul.f32 (%p776_p9), %v783_v1, %v1392_v30  ;;  %v800_v5 = vmul.f32 (%p776_p9), %v784_v2, %v1396_v35  ;;  %v801_v6 = vmul.f32 (%p776_p9), %v785_v3, %v1390_v28  ;;  %v786_v7 = vld [vmem:[#allocation2 + $0x18] sm:$0xff] (%p776_p9)  ;;  %v787_v8 = vld [vmem:[#allocation2 + $0x20] sm:$0xff] (%p776_p9)  ;;  %v788_v9 = vld [vmem:[#allocation2 + $0x28] sm:$0xff] (%p776_p9) }
 0x1fc   : > { %v802_v10 = vmul.f32 (%p776_p9), %v786_v7, %v1394_v32  ;;  %v803_v11 = vmul.f32 (%p776_p9), %v787_v8, %v1408_v50  ;;  %v804_v12 = vmul.f32 (%p776_p9), %v788_v9, %v1412_v55  ;;  %v789_v13 = vld [vmem:[#allocation2 + $0x30] sm:$0xff] (%p776_p9)  ;;  %v790_v14 = vld [vmem:[#allocation2 + $0x38] sm:$0xff] (%p776_p9)  ;;  %v791_v15 = vld [vmem:[#allocation2 + $0x40] sm:$0xff] (%p776_p9) }
 0x1fd   : > { %815 = vst [vmem:[%s1299_s9] sm:$0xff] (%p776_p9), %v799_v4  ;;  %816 = vst [vmem:[%s1299_s9 + $0x8] sm:$0xff] (%p776_p9), %v800_v5  ;;  %v805_v16 = vmul.f32 (%p776_p9), %v789_v13, %v1406_v48  ;;  %v806_v17 = vmul.f32 (%p776_p9), %v790_v14, %v1410_v52  ;;  %v807_v18 = vmul.f32 (%p776_p9), %v791_v15, %v1400_v40  ;;  %v792_v19 = vld [vmem:[#allocation2 + $0x48] sm:$0xff] (%p776_p9)  ;;  %v793_v20 = vld [vmem:[#allocation2 + $0x50] sm:$0xff] (%p776_p9) }
 0x1fe   : > { %817 = vst [vmem:[%s1299_s9 + $0x10] sm:$0xff] (%p776_p9), %v801_v6  ;;  %v794_v21 = vld [vmem:[#allocation2 + $0x58] sm:$0xff] (%p776_p9)  ;;  %818 = vst [vmem:[%s1299_s9 + $0x18] sm:$0xff] (%p776_p9), %v802_v10  ;;  %v808_v22 = vmul.f32 (%p776_p9), %v792_v19, %v1404_v44  ;;  %v809_v23 = vmul.f32 (%p776_p9), %v793_v20, %v1398_v37  ;;  %v795_v25 = vld [vmem:[#allocation2 + $0x60] sm:$0xff] (%p776_p9) }
 0x1ff   : > { %819 = vst [vmem:[%s1299_s9 + $0x20] sm:$0xff] (%p776_p9), %v803_v11  ;;  %820 = vst [vmem:[%s1299_s9 + $0x28] sm:$0xff] (%p776_p9), %v804_v12  ;;  %v810_v24 = vmul.f32 (%p776_p9), %v794_v21, %v1402_v42  ;;  %v796_v26 = vld [vmem:[#allocation2 + $0x68] sm:$0xff] (%p776_p9)  ;;  %v797_v27 = vld [vmem:[#allocation2 + $0x70] sm:$0xff] (%p776_p9)  ;;  %v811_v29 = vmul.f32 (%p776_p9), %v795_v25, %v1416_v60 }
 0x200   : > { %821 = vst [vmem:[%s1299_s9 + $0x30] sm:$0xff] (%p776_p9), %v805_v16  ;;  %822 = vst [vmem:[%s1299_s9 + $0x38] sm:$0xff] (%p776_p9), %v806_v17  ;;  %v812_v31 = vmul.f32 (%p776_p9), %v796_v26, %v1420_v0  ;;  %v813_v33 = vmul.f32 (%p776_p9), %v797_v27, %v1414_v57  ;;  %v798_v34 = vld [vmem:[#allocation2 + $0x78] sm:$0xff] (%p776_p9) }
 0x201   : > { %823 = vst [vmem:[%s1299_s9 + $0x40] sm:$0xff] (%p776_p9), %v807_v18  ;;  %824 = vst [vmem:[%s1299_s9 + $0x48] sm:$0xff] (%p776_p9), %v808_v22  ;;  %v814_v36 = vmul.f32 (%p776_p9), %v798_v34, %v1418_v62 }
 0x202   : > { %825 = vst [vmem:[%s1299_s9 + $0x50] sm:$0xff] %v809_v23  ;;  %826 = vst [vmem:[%s1299_s9 + $0x58] sm:$0xff] %v810_v24 }
 0x203   : > { %827 = vst [vmem:[%s1299_s9 + $0x60] sm:$0xff] %v811_v29  ;;  %828 = vst [vmem:[%s1299_s9 + $0x68] sm:$0xff] %v812_v31 }
 0x204   : > { %829 = vst [vmem:[%s1299_s9 + $0x70] sm:$0xff] %v813_v33  ;;  %830 = vst [vmem:[%s1299_s9 + $0x78] sm:$0xff] %v814_v36 }
 0x205 PF: > { %p1080_p10 = scmp.ne.s32.totalorder %s1506_s24, 1 }
 0x206   : > { %s1235_s25 = smov (!%p1080_p10), 0  }
 0x207   : > { %834 = sbr.rel (%p1080_p10) target bundleno = 540 (0x21c), region = 170 }
 0x20e LB: >> { %1213 = dma.done.wait [#allocation4 + $0x1], 16  ;;  %s1237_s25 = sphi %s1235_s25, %s840_s25  }
 0x20f   : >> { %1214 = vsyncadd [#allocation4 + $0x1], 4294967280  ;;  %s840_s25 = sadd.s32 1, %s1237_s25  }
 0x210   : >> { %p837_p11 = scmp.ge.s32.totalorder %s840_s25, 128  }
 0x211   : > { %v845_v38 = vld [vmem:[#allocation3] sm:$0xff] (%p837_p11)  ;;  %v846_v39 = vld [vmem:[#allocation3 + $0x8] sm:$0xff] (%p837_p11)  ;;  %v847_v41 = vld [vmem:[#allocation3 + $0x10] sm:$0xff] (%p837_p11) }
 0x212   : > { %839 = sbr.rel (!%p837_p11) target bundleno = 526 (0x20e), region = 293  ;;  %v861_v43 = vmul.f32 (%p837_p11), %v845_v38, %v1392_v30  ;;  %v862_v45 = vmul.f32 (%p837_p11), %v846_v39, %v1396_v35  ;;  %v863_v46 = vmul.f32 (%p837_p11), %v847_v41, %v1390_v28  ;;  %v848_v47 = vld [vmem:[#allocation3 + $0x18] sm:$0xff] (%p837_p11)  ;;  %v849_v49 = vld [vmem:[#allocation3 + $0x20] sm:$0xff] (%p837_p11)  ;;  %v850_v51 = vld [vmem:[#allocation3 + $0x28] sm:$0xff] (%p837_p11) }
 0x213   : > { %v864_v53 = vmul.f32 (%p837_p11), %v848_v47, %v1394_v32  ;;  %v865_v54 = vmul.f32 (%p837_p11), %v849_v49, %v1408_v50  ;;  %v866_v56 = vmul.f32 (%p837_p11), %v850_v51, %v1412_v55  ;;  %v851_v58 = vld [vmem:[#allocation3 + $0x30] sm:$0xff] (%p837_p11)  ;;  %v852_v59 = vld [vmem:[#allocation3 + $0x38] sm:$0xff] (%p837_p11)  ;;  %v853_v61 = vld [vmem:[#allocation3 + $0x40] sm:$0xff] (%p837_p11) }
 0x214   : > { %877 = vst [vmem:[%s1299_s9] sm:$0xff] (%p837_p11), %v861_v43  ;;  %878 = vst [vmem:[%s1299_s9 + $0x8] sm:$0xff] (%p837_p11), %v862_v45  ;;  %v867_v28 = vmul.f32 (%p837_p11), %v851_v58, %v1406_v48  ;;  %v868_v30 = vmul.f32 (%p837_p11), %v852_v59, %v1410_v52  ;;  %v869_v32 = vmul.f32 (%p837_p11), %v853_v61, %v1400_v40  ;;  %v854_v35 = vld [vmem:[#allocation3 + $0x48] sm:$0xff] (%p837_p11)  ;;  %v855_v50 = vld [vmem:[#allocation3 + $0x50] sm:$0xff] (%p837_p11) }
 0x215   : > { %879 = vst [vmem:[%s1299_s9 + $0x10] sm:$0xff] (%p837_p11), %v863_v46  ;;  %v856_v63 = vld [vmem:[#allocation3 + $0x58] sm:$0xff] (%p837_p11)  ;;  %880 = vst [vmem:[%s1299_s9 + $0x18] sm:$0xff] (%p837_p11), %v864_v53  ;;  %v870_v55 = vmul.f32 (%p837_p11), %v854_v35, %v1404_v44  ;;  %v871_v1 = vmul.f32 (%p837_p11), %v855_v50, %v1398_v37  ;;  %v857_v52 = vld [vmem:[#allocation3 + $0x60] sm:$0xff] (%p837_p11) }
 0x216   : > { %881 = vst [vmem:[%s1299_s9 + $0x20] sm:$0xff] (%p837_p11), %v865_v54  ;;  %882 = vst [vmem:[%s1299_s9 + $0x28] sm:$0xff] (%p837_p11), %v866_v56  ;;  %v872_v48 = vmul.f32 (%p837_p11), %v856_v63, %v1402_v42  ;;  %v858_v40 = vld [vmem:[#allocation3 + $0x68] sm:$0xff] (%p837_p11)  ;;  %v859_v2 = vld [vmem:[#allocation3 + $0x70] sm:$0xff] (%p837_p11)  ;;  %v873_v3 = vmul.f32 (%p837_p11), %v857_v52, %v1416_v60 }
 0x217   : > { %883 = vst [vmem:[%s1299_s9 + $0x30] sm:$0xff] (%p837_p11), %v867_v28  ;;  %884 = vst [vmem:[%s1299_s9 + $0x38] sm:$0xff] (%p837_p11), %v868_v30  ;;  %v874_v4 = vmul.f32 (%p837_p11), %v858_v40, %v1420_v0  ;;  %v875_v44 = vmul.f32 (%p837_p11), %v859_v2, %v1414_v57  ;;  %v860_v5 = vld [vmem:[#allocation3 + $0x78] sm:$0xff] (%p837_p11) }
 0x218   : > { %885 = vst [vmem:[%s1299_s9 + $0x40] sm:$0xff] (%p837_p11), %v869_v32  ;;  %886 = vst [vmem:[%s1299_s9 + $0x48] sm:$0xff] (%p837_p11), %v870_v55  ;;  %v876_v37 = vmul.f32 (%p837_p11), %v860_v5, %v1418_v62 }
 0x219   : > { %887 = vst [vmem:[%s1299_s9 + $0x50] sm:$0xff] %v871_v1  ;;  %888 = vst [vmem:[%s1299_s9 + $0x58] sm:$0xff] %v872_v48 }
 0x21a   : > { %889 = vst [vmem:[%s1299_s9 + $0x60] sm:$0xff] %v873_v3  ;;  %890 = vst [vmem:[%s1299_s9 + $0x68] sm:$0xff] %v874_v4 }
 0x21b   : > { %891 = vst [vmem:[%s1299_s9 + $0x70] sm:$0xff] %v875_v44  ;;  %892 = vst [vmem:[%s1299_s9 + $0x78] sm:$0xff] %v876_v37 }
 0x21c PF: > { %s21_s23 = sadd.s32 1, %s1217_s23  }
 0x21d   : > { %p18_p12 = scmp.ge.s32.totalorder %s21_s23, 6  }
 0x21f   :  { %20 = sbr.rel (!%p18_p12) target bundleno = 16 (0x10), region = 304 }
 0x226   :  { %915 = vsyncmov [#allocation4] }
 0x229   :  { %s916_s26 = vpop.sfrf %915 }
 0x22a   :  { %p1083_p13 = scmp.ne.s32.totalorder %s916_s26, 0 }
 0x22c   :  { %920 = shalt.err (%p1083_p13)  }
 0x22d   :  { %922 = vsyncmov [#allocation4 + $0x1] }
 0x230   :  { %s923_s27 = vpop.sfrf %922 }
 0x231   :  { %p1084_p0 = scmp.ne.s32.totalorder %s923_s27, 0 }
 0x233   :  { %927 = shalt.err (%p1084_p0)  }

// kernel: forward.7
= control target key start
LH: loop header
LB: loop body
LE: loop exit
PB: predicated region body
PF: predicated region fallthrough
CT: control target
= control target key end

     0   :  { %s615_s12 = smov 0   ;;  %s702_s0 = inlined_call_operand.vmem [shape: f32[256,128], index: 0, kind: input, shape index: {}]   ;;  %s703_s1 = inlined_call_operand.vmem [shape: bf16[128,128], index: 1, kind: input, shape index: {}]   ;;  %s704_s2 = inlined_call_operand.vmem [shape: f32[1,128], index: 2, kind: input, shape index: {}]   ;;  %s705_s3 = inlined_call_operand.vmem [shape: f32[256,128], index: 3, kind: output, shape index: {}]  }
   0x1 LB: > { %s455_s13 = sadd.s32 4294967295, %s593_s12   ;;  %p459_p0 = scmp.ge.s32.totalorder %s593_s12, 1  ;;  %s593_s12 = sphi %s615_s12, %s13_s12  }
   0x2   : > { %p138_p1 = scmp.lt.s32.totalorder %s593_s12, 3 }
   0x4   : > { %p139_p2 = pnand %p459_p0, %p138_p1 }
   0x5   : > { %v547_v0 = vld [vmem:[%s703_s1] sm:$0xff] (!%p139_p2)   ;;  %s460_s16 = sshll.u32 (!%p139_p2), %s455_s13, 4  ;;  %v548_v1 = vld [vmem:[%s703_s1 + $0x8] sm:$0xff] (!%p139_p2)   ;;  %v549_v2 = vld [vmem:[%s703_s1 + $0x10] sm:$0xff] (!%p139_p2)  }
   0x6   : > { %142 = sbr.rel (%p139_p2) target bundleno = 279 (0x117), region = 32  ;;  %p163_p3 = scmp.lt.s32.totalorder (!%p139_p2), %s460_s16, 31  ;;  %491 = vmatprep.subr.bf16.mxu0 (!%p139_p2), %v547_v0  ;;  %523 = vmatprep.subr.bf16.mxu1 (!%p139_p2), %v547_v0  ;;  %v550_v3 = vld [vmem:[%s703_s1 + $0x18] sm:$0xff] (!%p139_p2)   ;;  %v551_v10 = vld [vmem:[%s703_s1 + $0x20] sm:$0xff] (!%p139_p2)   ;;  %v552_v11 = vld [vmem:[%s703_s1 + $0x28] sm:$0xff] (!%p139_p2)  }
   0x7   : > { %492 = vmatpush3.bf16.msra.mxu0 (!%p139_p2), %v547_v0  ;;  %531 = vmatpush3.bf16.msra.mxu1 (!%p139_p2), %v547_v0  ;;  %v553_v12 = vld [vmem:[%s703_s1 + $0x30] sm:$0xff] (!%p139_p2)   ;;  %v554_v13 = vld [vmem:[%s703_s1 + $0x38] sm:$0xff] (!%p139_p2)   ;;  %v464_v32 = vld [vmem:[%s704_s2] ss:$0 sm:$0xff] (!%p139_p2) }
   0x8   : > { %493 = vmatprep.subr.bf16.mxu0 (!%p139_p2), %v548_v1  ;;  %524 = vmatprep.subr.bf16.mxu1 (!%p139_p2), %v548_v1 }
   0xb   : > { %494 = vmatpush3.bf16.msra.mxu0 (!%p139_p2), %v548_v1  ;;  %532 = vmatpush3.bf16.msra.mxu1 (!%p139_p2), %v548_v1 }
   0xc   : > { %495 = vmatprep.subr.bf16.mxu0 (!%p139_p2), %v549_v2  ;;  %525 = vmatprep.subr.bf16.mxu1 (!%p139_p2), %v549_v2 }
   0xd   : > { %s707_s16 = smov (!%p163_p3, %s460_s16), 31 }
   0xe   : > { %s461_s21 = sshll.u32 %s707_s16, 3 }
   0xf   : > { %s640_s24 = scalar_lea.vmem %s702_s0, %s461_s21  ;;  %496 = vmatpush3.bf16.msra.mxu0 %v549_v2  ;;  %533 = vmatpush3.bf16.msra.mxu1 %v549_v2  ;;  %s681_s13 = scalar_lea.vmem %s705_s3, %s461_s21 }
  0x10   : > { %v175_v4 = vld [vmem:[%s640_s24] sm:$0xff]  ;;  %v176_v5 = vld [vmem:[%s640_s24 + $0x8] sm:$0xff]  ;;  %497 = vmatprep.subr.bf16.mxu0 %v550_v3  ;;  %526 = vmatprep.subr.bf16.mxu1 %v550_v3  ;;  %v177_v14 = vld [vmem:[%s640_s24 + $0x10] sm:$0xff] }
  0x11   : > { %v183_v6 = vld [vmem:[%s640_s24 + $0x40] sm:$0xff]  ;;  %v191_v7 = vpack.c.bf16 %v176_v5, %v175_v4  ;;  %v184_v8 = vld [vmem:[%s640_s24 + $0x48] sm:$0xff]  ;;  %v178_v15 = vld [vmem:[%s640_s24 + $0x18] sm:$0xff] }
  0x12   : > { %v195_v9 = vpack.c.bf16 %v184_v8, %v183_v6  ;;  %v185_v16 = vld [vmem:[%s640_s24 + $0x50] sm:$0xff]  ;;  %v186_v17 = vld [vmem:[%s640_s24 + $0x58] sm:$0xff]  ;;  %v179_v18 = vld [vmem:[%s640_s24 + $0x20] sm:$0xff]  ;;  %v192_v22 = vpack.c.bf16 %v178_v15, %v177_v14 }
  0x13   : > { %507 = vmatprep.mubr.bf16.mxu0 %v191_v7  ;;  %498 = vmatpush3.bf16.msra.mxu0 %v550_v3  ;;  %v180_v19 = vld [vmem:[%s640_s24 + $0x28] sm:$0xff]  ;;  %v187_v20 = vld [vmem:[%s640_s24 + $0x60] sm:$0xff]  ;;  %v196_v23 = vpack.c.bf16 %v186_v17, %v185_v16  ;;  %v181_v26 = vld [vmem:[%s640_s24 + $0x30] sm:$0xff] }
  0x14   : > { %515 = vmatprep.mubr.bf16.mxu1 %v195_v9  ;;  %534 = vmatpush3.bf16.msra.mxu1 %v550_v3  ;;  %v188_v21 = vld [vmem:[%s640_s24 + $0x68] sm:$0xff]  ;;  %v193_v24 = vpack.c.bf16 %v180_v19, %v179_v18  ;;  %v182_v27 = vld [vmem:[%s640_s24 + $0x38] sm:$0xff]  ;;  %v189_v28 = vld [vmem:[%s640_s24 + $0x70] sm:$0xff] }
  0x15   : > { %499 = vmatprep.subr.bf16.mxu0 %v551_v10  ;;  %527 = vmatprep.subr.bf16.mxu1 %v551_v10  ;;  %v197_v25 = vpack.c.bf16 %v188_v21, %v187_v20  ;;  %v190_v29 = vld [vmem:[%s640_s24 + $0x78] sm:$0xff]  ;;  %v194_v30 = vpack.c.bf16 %v182_v27, %v181_v26 }
  0x16   : > { %v198_v31 = vpack.c.bf16 %v190_v29, %v189_v28 }
  0x17   : > { %500 = vmatpush3.bf16.msra.mxu0 %v551_v10 }
  0x18   : > { %535 = vmatpush3.bf16.msra.mxu1 %v551_v10  ;;  %501 = vmatprep.subr.bf16.mxu0 %v552_v11 }
  0x19   : > { %528 = vmatprep.subr.bf16.mxu1 %v552_v11 }
  0x1b   : > { %502 = vmatpush3.bf16.msra.mxu0 %v552_v11 }
  0x1c   : > { %536 = vmatpush3.bf16.msra.mxu1 %v552_v11  ;;  %503 = vmatprep.subr.bf16.mxu0 %v553_v12 }
  0x1d   : > { %529 = vmatprep.subr.bf16.mxu1 %v553_v12 }
  0x1f   : > { %504 = vmatpush3.bf16.msra.mxu0 %v553_v12 }
  0x20   : > { %537 = vmatpush3.bf16.msra.mxu1 %v553_v12  ;;  %505 = vmatprep.subr.bf16.mxu0 %v554_v13 }
  0x21   : > { %530 = vmatprep.subr.bf16.mxu1 %v554_v13 }
  0x23   : > { %506 = vmatpush3.bf16.msra.mxu0 %v554_v13 }
  0x24   : > { %538 = vmatpush3.bf16.msra.mxu1 %v554_v13 }
  0x26   : > { %508 = vmatmul.mubr.bf16.vlgmr.msra.gmra.mrb[0].mxu0 %v192_v22 }
  0x27   : > { %516 = vmatmul.mubr.bf16.vlgmr.msra.gmra.mrb[0].mxu1 %v196_v23  ;;  %511 = vmatprep.mubr.bf16.mxu0 %v193_v24 }
  0x28   : > { %519 = vmatprep.mubr.bf16.mxu1 %v197_v25 }
  0x2e   : > { %512 = vmatmul.mubr.bf16.gmra.mrb[4].mxu0 %v194_v30 }
  0x2f   : > { %520 = vmatmul.mubr.bf16.gmra.mrb[4].mxu1 %v198_v31 }
  0xf9   : > { %v509_v33 = vpop.f32.mrb[0].mxu0 }
  0xfa   : > { %v517_v34 = vpop.f32.mrb[0].mxu1  ;;  %v313_v35 = vadd.f32 %v509_v33, %v464_v32  ;;  %v304_v37 = vpop.f32.mrb[1].mxu0 }
  0xfb   : > { %v345_v36 = vadd.f32 %v517_v34, %v464_v32  ;;  %v336_v38 = vpop.f32.mrb[1].mxu1  ;;  %v305_v39 = vadd.f32 %v464_v32, %v304_v37  ;;  %v510_v41 = vpop.f32.mrb[2].mxu0 }
  0xfc   : > { %v337_v40 = vadd.f32 %v464_v32, %v336_v38  ;;  %v518_v42 = vpop.f32.mrb[2].mxu1  ;;  %555 = vtanh.f32 %v313_v35  ;;  %v316_v43 = vadd.f32 %v510_v41, %v464_v32  ;;  %v307_v44 = vpop.f32.mrb[3].mxu0 }
  0xfd   : > { %v339_v45 = vpop.f32.mrb[3].mxu1  ;;  %557 = vtanh.f32 %v345_v36  ;;  %v348_v46 = vadd.f32 %v518_v42, %v464_v32  ;;  %v308_v47 = vadd.f32 %v464_v32, %v307_v44 }
  0xfe   : > { %559 = vtanh.f32 %v305_v39  ;;  %v340_v48 = vadd.f32 %v464_v32, %v339_v45 }
  0xff   : > { %561 = vtanh.f32 %v337_v40 }
 0x100   : > { %563 = vtanh.f32 %v316_v43 }
 0x101   : > { %565 = vtanh.f32 %v348_v46  ;;  %v513_v49 = vpop.f32.mrb[4].mxu0 }
 0x102   : > { %v521_v50 = vpop.f32.mrb[4].mxu1  ;;  %567 = vtanh.f32 %v308_v47  ;;  %v329_v51 = vadd.f32 %v513_v49, %v464_v32  ;;  %v320_v53 = vpop.f32.mrb[5].mxu0 }
 0x103   : > { %v361_v52 = vadd.f32 %v521_v50, %v464_v32  ;;  %v352_v54 = vpop.f32.mrb[5].mxu1  ;;  %569 = vtanh.f32 %v340_v48  ;;  %v321_v55 = vadd.f32 %v464_v32, %v320_v53  ;;  %v514_v57 = vpop.f32.mrb[6].mxu0 }
 0x104   : > { %v353_v56 = vadd.f32 %v464_v32, %v352_v54  ;;  %v522_v58 = vpop.f32.mrb[6].mxu1  ;;  %571 = vtanh.f32 %v329_v51  ;;  %v332_v59 = vadd.f32 %v514_v57, %v464_v32  ;;  %v323_v60 = vpop.f32.mrb[7].mxu0 }
 0x105   : > { %v355_v61 = vpop.f32.mrb[7].mxu1  ;;  %573 = vtanh.f32 %v361_v52  ;;  %v364_v62 = vadd.f32 %v522_v58, %v464_v32  ;;  %v324_v0 = vadd.f32 %v464_v32, %v323_v60 }
 0x106   : > { %v556_v63 = vpop.eup %555  ;;  %575 = vtanh.f32 %v321_v55  ;;  %v356_v2 = vadd.f32 %v464_v32, %v355_v61 }
 0x107   : > { %v558_v1 = vpop.eup %557  ;;  %385 = vst [vmem:[%s681_s13 + $0x10] sm:$0xff] %v556_v63  ;;  %577 = vtanh.f32 %v353_v56 }
 0x108   : > { %v560_v3 = vpop.eup %559  ;;  %393 = vst [vmem:[%s681_s13 + $0x50] sm:$0xff] %v558_v1  ;;  %579 = vtanh.f32 %v332_v59 }
 0x109   : > { %v562_v4 = vpop.eup %561  ;;  %383 = vst [vmem:[%s681_s13] sm:$0xff] %v560_v3  ;;  %581 = vtanh.f32 %v364_v62 }
 0x10a   : > { %v564_v5 = vpop.eup %563  ;;  %391 = vst [vmem:[%s681_s13 + $0x40] sm:$0xff] %v562_v4  ;;  %583 = vtanh.f32 %v324_v0 }
 0x10b   : > { %v566_v6 = vpop.eup %565  ;;  %386 = vst [vmem:[%s681_s13 + $0x18] sm:$0xff] %v564_v5  ;;  %585 = vtanh.f32 %v356_v2 }
 0x10c   : > { %v568_v7 = vpop.eup %567  ;;  %394 = vst [vmem:[%s681_s13 + $0x58] sm:$0xff] %v566_v6 }
 0x10d   : > { %v570_v8 = vpop.eup %569  ;;  %384 = vst [vmem:[%s681_s13 + $0x8] sm:$0xff] %v568_v7 }
 0x10e   : > { %v572_v9 = vpop.eup %571  ;;  %392 = vst [vmem:[%s681_s13 + $0x48] sm:$0xff] %v570_v8 }
 0x10f   : > { %v574_v10 = vpop.eup %573  ;;  %389 = vst [vmem:[%s681_s13 + $0x30] sm:$0xff] %v572_v9 }
 0x110   : > { %v576_v11 = vpop.eup %575  ;;  %397 = vst [vmem:[%s681_s13 + $0x70] sm:$0xff] %v574_v10 }
 0x111   : > { %v578_v12 = vpop.eup %577  ;;  %387 = vst [vmem:[%s681_s13 + $0x20] sm:$0xff] %v576_v11 }
 0x112   : > { %v580_v13 = vpop.eup %579  ;;  %395 = vst [vmem:[%s681_s13 + $0x60] sm:$0xff] %v578_v12 }
 0x113   : > { %v582_v14 = vpop.eup %581  ;;  %390 = vst [vmem:[%s681_s13 + $0x38] sm:$0xff] %v580_v13 }
 0x114   : > { %v584_v15 = vpop.eup %583  ;;  %398 = vst [vmem:[%s681_s13 + $0x78] sm:$0xff] %v582_v14 }
 0x115   : > { %v586_v16 = vpop.eup %585  ;;  %388 = vst [vmem:[%s681_s13 + $0x28] sm:$0xff] %v584_v15 }
 0x116   : > { %396 = vst [vmem:[%s681_s13 + $0x68] sm:$0xff] %v586_v16 }
 0x117 PF: > { %s13_s12 = sadd.s32 1, %s593_s12  }
 0x118   : > { %p10_p4 = scmp.ge.s32.totalorder %s13_s12, 4  }
 0x11a   :  { %12 = sbr.rel (!%p10_p4) target bundleno = 1 (0x1), region = 62 }

// kernel: forward.11
= control target key start
LH: loop header
LB: loop body
LE: loop exit
PB: predicated region body
PF: predicated region fallthrough
CT: control target
= control target key end

     0   :  { %s704_s0 = inlined_call_operand.vmem [shape: s32[128], index: 0, kind: input, shape index: {}]   ;;  %s705_s2 = inlined_call_operand.vmem [shape: f32[256,128], index: 2, kind: input, shape index: {}]   ;;  %s706_s3 = inlined_call_operand.vmem [shape: bf16[128,128], index: 3, kind: input, shape index: {}]   ;;  %s707_s4 = inlined_call_operand.vmem [shape: f32[1,128], index: 4, kind: input, shape index: {}]   ;;  %s708_s5 = inlined_call_operand.hbm [shape: f32[128,128], index: 5, kind: output, shape index: {}]   ;;  %s709_s1 = inlined_call_operand.vmem [shape: s32[128], index: 1, kind: input, shape index: {}]  }
   0x1   :  { %s10_s20 = sshll.u32 %s704_s0, 4  ;;  %s14_s23 = sshll.u32 %s709_s1, 4  ;;  %s11_s20 = int_to_ptr.vmem [resolvable:$true] %s10_s20  ;;  %s15_s23 = int_to_ptr.vmem [resolvable:$true] %s14_s23 }
   0x2   :  { %s548_s24 = scalar_lea.vmem %s11_s20, 16  ;;  %p553_p1 = scmp.lt.s32.totalorder %s11_s20, %s11_s20 }
   0x3   :  { %p549_p0 = scmp.ne.s32.totalorder %s11_s20, %s548_s24  ;;  %p554_p2 = scmp.lt.s32.totalorder %s548_s24, %s548_s24 }
   0x5   :  { %p555_p3 = por %p554_p2, %p553_p1 }
   0x7   :  { %p556_p4 = pnand %p555_p3, %p549_p0 }
   0x9   :  { %559 = shalt.err (!%p556_p4)  }
   0xa   :  { %s618_s25 = smov [#allocation6]   ;;  %s560_s26 = scalar_lea.vmem %s15_s23, 16 }
   0xb   :  { %13 = dma.vmem_to_smem %s11_s20, 16, %s618_s25, [#allocation5] }
   0xc   :  { %p561_p5 = scmp.ne.s32.totalorder %s15_s23, %s560_s26  ;;  %p565_p6 = scmp.lt.s32.totalorder %s15_s23, %s15_s23 }
   0xd   :  { %p566_p7 = scmp.lt.s32.totalorder %s560_s26, %s560_s26 }
   0xf   :  { %p567_p8 = por %p566_p7, %p565_p6 }
  0x11   :  { %p568_p9 = pnand %p567_p8, %p561_p5 }
  0x13   :  { %571 = shalt.err (!%p568_p9)  }
  0x14   :  { %s619_s0 = smov [#allocation7]  }
  0x15   :  { %17 = dma.vmem_to_smem %s15_s23, 16, %s619_s0, [#allocation5] }
  0x16   :  { %602 = dma.done.wait [#allocation5], 32 }
  0x17   :  { %603 = vsyncadd [#allocation5], 4294967264 }
  0x18   :  { %19 = sfence }
  0x19   :  { %20 = vsyncpa [#allocation9], 0  ;;  %s610_s1 = smov 0  }
  0x1a LB: > { %s34_s27 = sld [smem:[#allocation6 + %s612_s1]]  ;;  %s36_s6 = scalar_lea.vmem [#allocation2], %s612_s1  ;;  %s612_s1 = sphi %s610_s1, %s32_s1  }
  0x20   : > { %s35_s30 = scalar_lea.vmem %s705_s2, %s34_s27 }
  0x21   : > { %v54_v0 = vld [vmem:[%s35_s30] sm:$0x1] }
  0x22   : > { %55 = vst [vmem:[%s36_s6] sm:$0x1] %v54_v0 }
  0x23   : > { %80 = vsyncadd [#allocation4], 16  ;;  %s81_s7 = sld [smem:[#allocation7 + %s612_s1]]  ;;  %s83_s11 = scalar_lea.vmem [#allocation3], %s612_s1 }
  0x29   : > { %s82_s10 = scalar_lea.vmem %s705_s2, %s81_s7 }
  0x2a   : > { %v102_v1 = vld [vmem:[%s82_s10] sm:$0x1] }
  0x2b   : > { %103 = vst [vmem:[%s83_s11] sm:$0x1] %v102_v1 }
  0x2c   : > { %128 = vsyncadd [#allocation4 + $0x1], 16  ;;  %s32_s1 = sadd.s32 1, %s612_s1  }
  0x2d   : > { %p29_p10 = scmp.ge.s32.totalorder %s32_s1, 128  }
  0x2e   :  { %s614_s12 = smov (%p29_p10), 0  }
  0x2f   :  { %31 = sbr.rel (!%p29_p10) target bundleno = 26 (0x1a), region = 129 }
  0x36 LB: > { %604 = dma.done.wait [#allocation4], 16  ;;  %s616_s12 = sphi %s614_s12, %s134_s12  }
  0x37   : > { %605 = vsyncadd [#allocation4], 4294967280 }
  0x38   : > { %606 = dma.done.wait [#allocation4 + $0x1], 16 }
  0x39   : > { %607 = vsyncadd [#allocation4 + $0x1], 4294967280  ;;  %s134_s12 = sadd.s32 1, %s616_s12  }
  0x3a   : > { %p131_p11 = scmp.ge.s32.totalorder %s134_s12, 128  }
  0x3b   :  { %v540_v2 = vld [vmem:[%s706_s3] sm:$0xff] (%p131_p11)   ;;  %v541_v3 = vld [vmem:[%s706_s3 + $0x8] sm:$0xff] (%p131_p11)   ;;  %v542_v4 = vld [vmem:[%s706_s3 + $0x10] sm:$0xff] (%p131_p11)  }
  0x3c   :  { %133 = sbr.rel (!%p131_p11) target bundleno = 54 (0x36), region = 140  ;;  %471 = vmatprep.subr.bf16.mxu0 (%p131_p11), %v540_v2  ;;  %503 = vmatprep.subr.bf16.mxu1 (%p131_p11), %v540_v2  ;;  %v543_v5 = vld [vmem:[%s706_s3 + $0x18] sm:$0xff] (%p131_p11)   ;;  %v141_v6 = vld [vmem:[#allocation2] sm:$0xff] (%p131_p11)  ;;  %v142_v7 = vld [vmem:[#allocation2 + $0x8] sm:$0xff] (%p131_p11) }
  0x3d   :  { %472 = vmatpush3.bf16.msra.mxu0 (%p131_p11), %v540_v2  ;;  %511 = vmatpush3.bf16.msra.mxu1 (%p131_p11), %v540_v2  ;;  %v157_v8 = vld [vmem:[#allocation3] sm:$0xff] (%p131_p11)  ;;  %v158_v9 = vld [vmem:[#allocation3 + $0x8] sm:$0xff] (%p131_p11)  ;;  %v546_v22 = vld [vmem:[%s706_s3 + $0x30] sm:$0xff] (%p131_p11)  }
  0x3e   :  { %473 = vmatprep.subr.bf16.mxu0 (%p131_p11), %v541_v3  ;;  %504 = vmatprep.subr.bf16.mxu1 (%p131_p11), %v541_v3  ;;  %v173_v10 = vmul.f32 (%p131_p11), %v157_v8, %v141_v6  ;;  %v149_v11 = vld [vmem:[#allocation2 + $0x40] sm:$0xff] (%p131_p11)  ;;  %v150_v12 = vld [vmem:[#allocation2 + $0x48] sm:$0xff] (%p131_p11)  ;;  %v174_v13 = vmul.f32 (%p131_p11), %v158_v9, %v142_v7  ;;  %v143_v23 = vld [vmem:[#allocation2 + $0x10] sm:$0xff] (%p131_p11) }
  0x3f   :  { %v165_v14 = vld [vmem:[#allocation3 + $0x40] sm:$0xff] (%p131_p11)  ;;  %v166_v15 = vld [vmem:[#allocation3 + $0x48] sm:$0xff] (%p131_p11)  ;;  %v159_v24 = vld [vmem:[#allocation3 + $0x10] sm:$0xff] (%p131_p11) }
  0x40   :  { %v181_v16 = vmul.f32 (%p131_p11), %v165_v14, %v149_v11  ;;  %v182_v17 = vmul.f32 (%p131_p11), %v166_v15, %v150_v12  ;;  %v544_v18 = vld [vmem:[%s706_s3 + $0x20] sm:$0xff] (%p131_p11)   ;;  %v189_v19 = vpack.c.bf16 (%p131_p11), %v174_v13, %v173_v10  ;;  %v545_v21 = vld [vmem:[%s706_s3 + $0x28] sm:$0xff] (%p131_p11)   ;;  %v144_v25 = vld [vmem:[#allocation2 + $0x18] sm:$0xff] (%p131_p11)  ;;  %v175_v40 = vmul.f32 (%p131_p11), %v159_v24, %v143_v23 }
  0x41   :  { %474 = vmatpush3.bf16.msra.mxu0 (%p131_p11), %v541_v3  ;;  %512 = vmatpush3.bf16.msra.mxu1 (%p131_p11), %v541_v3  ;;  %v160_v26 = vld [vmem:[#allocation3 + $0x18] sm:$0xff] (%p131_p11)  ;;  %v151_v27 = vld [vmem:[#allocation2 + $0x50] sm:$0xff] (%p131_p11)  ;;  %v145_v32 = vld [vmem:[#allocation2 + $0x20] sm:$0xff] (%p131_p11) }
  0x42   :  { %475 = vmatprep.subr.bf16.mxu0 (%p131_p11), %v542_v4  ;;  %505 = vmatprep.subr.bf16.mxu1 (%p131_p11), %v542_v4  ;;  %v193_v20 = vpack.c.bf16 (%p131_p11), %v182_v17, %v181_v16  ;;  %v152_v28 = vld [vmem:[#allocation2 + $0x58] sm:$0xff] (%p131_p11)  ;;  %v167_v29 = vld [vmem:[#allocation3 + $0x50] sm:$0xff] (%p131_p11)  ;;  %v146_v33 = vld [vmem:[#allocation2 + $0x28] sm:$0xff] (%p131_p11)  ;;  %v176_v41 = vmul.f32 (%p131_p11), %v160_v26, %v144_v25 }
  0x43   :  { %487 = vmatprep.mubr.bf16.mxu0 %v189_v19  ;;  %v547_v30 = vld [vmem:[%s706_s3 + $0x38] sm:$0xff]   ;;  %v161_v34 = vld [vmem:[#allocation3 + $0x20] sm:$0xff]  ;;  %v162_v35 = vld [vmem:[#allocation3 + $0x28] sm:$0xff]  ;;  %v183_v42 = vmul.f32 %v167_v29, %v151_v27 }
  0x44   :  { %495 = vmatprep.mubr.bf16.mxu1 %v193_v20  ;;  %v168_v31 = vld [vmem:[#allocation3 + $0x58] sm:$0xff]  ;;  %v153_v36 = vld [vmem:[#allocation2 + $0x60] sm:$0xff]  ;;  %v154_v37 = vld [vmem:[#allocation2 + $0x68] sm:$0xff]  ;;  %v177_v44 = vmul.f32 %v161_v34, %v145_v32  ;;  %v178_v45 = vmul.f32 %v162_v35, %v146_v33  ;;  %v190_v50 = vpack.c.bf16 %v176_v41, %v175_v40 }
  0x45   :  { %476 = vmatpush3.bf16.msra.mxu0 %v542_v4  ;;  %513 = vmatpush3.bf16.msra.mxu1 %v542_v4  ;;  %v169_v38 = vld [vmem:[#allocation3 + $0x60] sm:$0xff]  ;;  %v170_v39 = vld [vmem:[#allocation3 + $0x68] sm:$0xff]  ;;  %v184_v43 = vmul.f32 %v168_v31, %v152_v28  ;;  %v147_v48 = vld [vmem:[#allocation2 + $0x30] sm:$0xff] }
  0x46   :  { %477 = vmatprep.subr.bf16.mxu0 %v543_v5  ;;  %506 = vmatprep.subr.bf16.mxu1 %v543_v5  ;;  %v185_v46 = vmul.f32 %v169_v38, %v153_v36  ;;  %v186_v47 = vmul.f32 %v170_v39, %v154_v37  ;;  %v148_v49 = vld [vmem:[#allocation2 + $0x38] sm:$0xff]  ;;  %v163_v52 = vld [vmem:[#allocation3 + $0x30] sm:$0xff]  ;;  %v191_v55 = vpack.c.bf16 %v178_v45, %v177_v44  ;;  %v444_v2 = vld [vmem:[%s707_s4] ss:$0 sm:$0xff]  ;;  %s620_s4 = smov [#allocation8]  }
  0x47   :  { %v194_v51 = vpack.c.bf16 %v184_v43, %v183_v42  ;;  %v164_v53 = vld [vmem:[#allocation3 + $0x38] sm:$0xff]  ;;  %v155_v54 = vld [vmem:[#allocation2 + $0x70] sm:$0xff]  ;;  %v179_v60 = vmul.f32 %v163_v52, %v147_v48  ;;  %s386_s27 = sshll.u32 %s620_s4, 4  ;;  %s387_s27 = int_to_ptr.vmem [resolvable:$true] %s386_s27 }
  0x48   :  { %v195_v56 = vpack.c.bf16 %v186_v47, %v185_v46  ;;  %v156_v57 = vld [vmem:[#allocation2 + $0x78] sm:$0xff]  ;;  %v171_v58 = vld [vmem:[#allocation3 + $0x70] sm:$0xff]  ;;  %v180_v61 = vmul.f32 %v164_v53, %v148_v49  ;;  %s572_s28 = scalar_lea.vmem %s387_s27, 2048  ;;  %p577_p13 = scmp.lt.s32.totalorder %s387_s27, %s387_s27 }
  0x49   :  { %478 = vmatpush3.bf16.msra.mxu0 %v543_v5  ;;  %514 = vmatpush3.bf16.msra.mxu1 %v543_v5  ;;  %v172_v59 = vld [vmem:[#allocation3 + $0x78] sm:$0xff]  ;;  %v187_v62 = vmul.f32 %v171_v58, %v155_v54  ;;  %p573_p12 = scmp.ne.s32.totalorder %s387_s27, %s572_s28  ;;  %p578_p0 = scmp.lt.s32.totalorder %s572_s28, %s572_s28 }
  0x4a   :  { %479 = vmatprep.subr.bf16.mxu0 %v544_v18  ;;  %507 = vmatprep.subr.bf16.mxu1 %v544_v18  ;;  %v188_v63 = vmul.f32 %v172_v59, %v156_v57  ;;  %v192_v0 = vpack.c.bf16 %v180_v61, %v179_v60 }
  0x4b   :  { %p579_p1 = por %p578_p0, %p577_p13 }
  0x4c   :  { %v196_v1 = vpack.c.bf16 %v188_v63, %v187_v62 }
  0x4d   :  { %480 = vmatpush3.bf16.msra.mxu0 %v544_v18  ;;  %515 = vmatpush3.bf16.msra.mxu1 %v544_v18  ;;  %p580_p2 = pnand %p579_p1, %p573_p12 }
  0x4e   :  { %481 = vmatprep.subr.bf16.mxu0 %v545_v21  ;;  %508 = vmatprep.subr.bf16.mxu1 %v545_v21 }
  0x51   :  { %482 = vmatpush3.bf16.msra.mxu0 %v545_v21  ;;  %516 = vmatpush3.bf16.msra.mxu1 %v545_v21 }
  0x52   :  { %483 = vmatprep.subr.bf16.mxu0 %v546_v22  ;;  %509 = vmatprep.subr.bf16.mxu1 %v546_v22 }
  0x55   :  { %484 = vmatpush3.bf16.msra.mxu0 %v546_v22  ;;  %517 = vmatpush3.bf16.msra.mxu1 %v546_v22 }
  0x56   :  { %485 = vmatprep.subr.bf16.mxu0 %v547_v30  ;;  %510 = vmatprep.subr.bf16.mxu1 %v547_v30 }
  0x59   :  { %486 = vmatpush3.bf16.msra.mxu0 %v547_v30  ;;  %518 = vmatpush3.bf16.msra.mxu1 %v547_v30 }
  0x5c   :  { %488 = vmatmul.mubr.bf16.vlgmr.msra.gmra.mrb[0].mxu0 %v190_v50  ;;  %496 = vmatmul.mubr.bf16.vlgmr.msra.gmra.mrb[0].mxu1 %v194_v51 }
  0x5d   :  { %491 = vmatprep.mubr.bf16.mxu0 %v191_v55  ;;  %499 = vmatprep.mubr.bf16.mxu1 %v195_v56 }
  0x64   :  { %492 = vmatmul.mubr.bf16.gmra.mrb[4].mxu0 %v192_v0  ;;  %500 = vmatmul.mubr.bf16.gmra.mrb[4].mxu1 %v196_v1 }
 0x12f   :  { %v489_v3 = vpop.f32.mrb[0].mxu0  ;;  %v497_v4 = vpop.f32.mrb[0].mxu1 }
 0x130   :  { %v311_v5 = vadd.f32 %v489_v3, %v444_v2  ;;  %v343_v6 = vadd.f32 %v497_v4, %v444_v2  ;;  %v302_v7 = vpop.f32.mrb[1].mxu0  ;;  %v334_v8 = vpop.f32.mrb[1].mxu1 }
 0x131   :  { %v303_v9 = vadd.f32 %v444_v2, %v302_v7  ;;  %v335_v10 = vadd.f32 %v444_v2, %v334_v8  ;;  %v490_v11 = vpop.f32.mrb[2].mxu0  ;;  %v498_v12 = vpop.f32.mrb[2].mxu1 }
 0x132   :  { %367 = vst [vmem:[#allocation8 + $0x10] sm:$0xff] %v311_v5  ;;  %375 = vst [vmem:[#allocation8 + $0x50] sm:$0xff] %v343_v6  ;;  %v314_v13 = vadd.f32 %v490_v11, %v444_v2  ;;  %v346_v14 = vadd.f32 %v498_v12, %v444_v2  ;;  %v305_v15 = vpop.f32.mrb[3].mxu0  ;;  %v337_v16 = vpop.f32.mrb[3].mxu1 }
 0x133   :  { %365 = vst [vmem:[#allocation8] sm:$0xff] %v303_v9  ;;  %373 = vst [vmem:[#allocation8 + $0x40] sm:$0xff] %v335_v10  ;;  %v306_v17 = vadd.f32 %v444_v2, %v305_v15  ;;  %v338_v18 = vadd.f32 %v444_v2, %v337_v16 }
 0x134   :  { %368 = vst [vmem:[#allocation8 + $0x18] sm:$0xff] %v314_v13  ;;  %376 = vst [vmem:[#allocation8 + $0x58] sm:$0xff] %v346_v14 }
 0x135   :  { %366 = vst [vmem:[#allocation8 + $0x8] sm:$0xff] %v306_v17  ;;  %374 = vst [vmem:[#allocation8 + $0x48] sm:$0xff] %v338_v18 }
 0x137   :  { %v493_v19 = vpop.f32.mrb[4].mxu0  ;;  %v501_v20 = vpop.f32.mrb[4].mxu1 }
 0x138   :  { %v327_v21 = vadd.f32 %v493_v19, %v444_v2  ;;  %v359_v22 = vadd.f32 %v501_v20, %v444_v2  ;;  %v318_v23 = vpop.f32.mrb[5].mxu0  ;;  %v350_v24 = vpop.f32.mrb[5].mxu1 }
 0x139   :  { %v319_v25 = vadd.f32 %v444_v2, %v318_v23  ;;  %v351_v26 = vadd.f32 %v444_v2, %v350_v24  ;;  %v494_v27 = vpop.f32.mrb[6].mxu0  ;;  %v502_v28 = vpop.f32.mrb[6].mxu1 }
 0x13a   :  { %371 = vst [vmem:[#allocation8 + $0x30] sm:$0xff] %v327_v21  ;;  %379 = vst [vmem:[#allocation8 + $0x70] sm:$0xff] %v359_v22  ;;  %v330_v29 = vadd.f32 %v494_v27, %v444_v2  ;;  %v362_v30 = vadd.f32 %v502_v28, %v444_v2  ;;  %v321_v31 = vpop.f32.mrb[7].mxu0  ;;  %v353_v32 = vpop.f32.mrb[7].mxu1 }
 0x13b   :  { %369 = vst [vmem:[#allocation8 + $0x20] sm:$0xff] %v319_v25  ;;  %377 = vst [vmem:[#allocation8 + $0x60] sm:$0xff] %v351_v26  ;;  %v322_v33 = vadd.f32 %v444_v2, %v321_v31  ;;  %v354_v34 = vadd.f32 %v444_v2, %v353_v32 }
 0x13c   :  { %372 = vst [vmem:[#allocation8 + $0x38] sm:$0xff] %v330_v29  ;;  %380 = vst [vmem:[#allocation8 + $0x78] sm:$0xff] %v362_v30 }
 0x13d   :  { %370 = vst [vmem:[#allocation8 + $0x28] sm:$0xff] %v322_v33  ;;  %378 = vst [vmem:[#allocation8 + $0x68] sm:$0xff] %v354_v34 }
 0x13e   :  { %583 = shalt.err (!%p580_p2)
}
 0x13f   :  { %s584_s6 = scalar_lea.hbm %s708_s5, 2048 }
 0x140   :  { %p585_p3 = scmp.ne.s32.totalorder %s708_s5, %s584_s6  ;;  %p588_p4 = scmp.lt.u32.totalorder %s584_s6, %s708_s5 }
 0x142   :  { %p590_p5 = pnand %p588_p4, %p585_p3 }
 0x144   :  { %593 = shalt.err (!%p590_p5)
}
 0x145   :  { %s621_s11 = smov 128   ;;  %s622_s12 = smov 8  }
 0x146   :  { %392 = dma.vmem_to_hbm [thread:$0]  %s387_s27, 2048, %s708_s5, [#allocation9], %s621_s11, %s621_s11, %s622_s12  }
 0x147   :  { %608 = dma.done.wait [#allocation9], 2048  }
 0x148   :  { %609 = vsyncadd [#allocation9], 4294965248 }
 0x149   :  { %396 = vsyncpa [#allocation9], 1 }
 0x14a   :  { %397 = vsyncmov [#allocation4] }
 0x14d   :  { %s398_s15 = vpop.sfrf %397 }
 0x14e   :  { %p453_p6 = scmp.ne.s32.totalorder %s398_s15, 0 }
 0x150   :  { %402 = shalt.err (%p453_p6)  }
 0x151   :  { %404 = vsyncmov [#allocation4 + $0x1] }
 0x154   :  { %s405_s16 = vpop.sfrf %404 }
 0x155   :  { %p454_p7 = scmp.ne.s32.totalorder %s405_s16, 0 }
 0x157   :  { %409 = shalt.err (%p454_p7)  }

</bundles_post_ra>
